<compile_context>
chip_gen: v5e
topology: v5e:2x2
jax: 0.10.0
libtpu: 0.0.40
codegen_flags: <defaults>
</compile_context>

<pallas_src>
import math
import functools

import numpy as np
import jax
import jax.numpy as jnp
from jax.experimental import pallas as pl
from jax.experimental.pallas import tpu as pltpu

# ---------------- small synthetic config ----------------
IN_CHANNELS = 4        # diffusion embedding channels
VOCAB = 16             # vocab_size
HIDDEN = 32            # config.hidden_size
NUM_HEADS = 4
HEAD_DIM = HIDDEN // NUM_HEADS
NUM_LAYERS = 2         # config.num_hidden_layers
INTERMEDIATE = 4 * HIDDEN
MAX_POS = 64           # config.max_position_embeddings
LN_EPS = 1e-12         # config.layer_norm_eps
LOGIT_PAD = 128        # lane-dense padded logits width


# ---------------- in-kernel helpers ----------------
def _ln(h, g, b, eps):
    mu = jnp.mean(h, axis=-1, keepdims=True)
    var = jnp.mean((h - mu) ** 2, axis=-1, keepdims=True)
    return (h - mu) * jax.lax.rsqrt(var + eps) * g + b


def _gelu(x):
    # TODO(synk): HF BERT default is exact erf-GELU; tanh approximation kept
    # for guaranteed Mosaic lowering (same as previously validated kernel).
    return jax.nn.gelu(x, approximate=True)


# ---------------- the single fused kernel ----------------
def _fused_kernel(t_ref, x_ref, f_ref, pos_ref,
                  upw_ref, upb_ref, tw1_ref, tb1_ref, tw2_ref, tb2_ref,
                  eg_ref, eb_ref,
                  wqkv_ref, bqkv_ref, wo_ref, bo_ref, g1_ref, b1_ref,
                  wi_ref, bi_ref, wf_ref, bff_ref, g2_ref, b2_ref,
                  cw_ref, cb_ref, cg_ref, cbeta_ref, dw_ref, db_ref,
                  logits_ref, seq_ref, h_scratch,
                  *, seq, num_heads, head_dim, hidden, eps, scale_c, half):
    b = pl.program_id(0)          # batch index (parallel axis)
    l = pl.program_id(1)          # layer index (arbitrary axis)

    # ---------- phase 1 (l == 0): fused embedding path ----------
    @pl.when(l == 0)
    def _embed():
        x = x_ref[0]                                                   # [S, C]
        # TODO(synk): reference forward has no eps on this L2 norm; an
        # all-zero row NaNs exactly like the PyTorch module.
        xn = (scale_c * x) * jax.lax.rsqrt(jnp.sum(x * x, axis=-1, keepdims=True))
        emb_x = (jnp.dot(xn.astype(jnp.bfloat16), upw_ref[...],
                         preferred_element_type=jnp.float32) + upb_ref[...])   # [S, H]

        # sinusoidal timestep embedding cat([cos, sin]) fused with the time MLP
        tval = t_ref[b]                                                # scalar from SMEM
        targs = tval * f_ref[...]                                      # [1, H]
        col = jax.lax.broadcasted_iota(jnp.int32, targs.shape, 1)
        emb_t = jnp.where(col < half, jnp.cos(targs), jnp.sin(targs))  # [1, H]
        ht = (jnp.dot(emb_t.astype(jnp.bfloat16), tw1_ref[...],
                      preferred_element_type=jnp.float32) + tb1_ref[...])
        ht = ht * jax.nn.sigmoid(ht)                                   # SiLU
        temb = (jnp.dot(ht.astype(jnp.bfloat16), tw2_ref[...],
                        preferred_element_type=jnp.float32) + tb2_ref[...])    # [1, H]

        # VPU broadcast adds (no one-hot matmuls, no HBM-materialized copies)
        h = emb_x + pos_ref[...] + temb
        h_scratch[...] = _ln(h, eg_ref[...], eb_ref[...], eps)

    # ---------- phase 2 (every l): one fused BERT layer ----------
    h = h_scratch[...]                                                 # [S, H] f32
    # fused, lane-dense QKV projection (one [H,3H] matmul)
    qkv = (jnp.dot(h.astype(jnp.bfloat16), wqkv_ref[0],
                   preferred_element_type=jnp.float32) + bqkv_ref[0])  # [S, 3H]
    scale = 1.0 / math.sqrt(head_dim)
    ctx_heads = []
    # TODO(synk): at production num_heads/seq, move this static unroll to a
    # lax.fori_loop / grid axis to bound vreg live ranges.
    for hh in range(num_heads):
        q = qkv[:, hh * head_dim:(hh + 1) * head_dim]
        k = qkv[:, hidden + hh * head_dim:hidden + (hh + 1) * head_dim]
        v = qkv[:, 2 * hidden + hh * head_dim:2 * hidden + (hh + 1) * head_dim]
        s = jax.lax.dot_general(q, k, (((1,), (1,)), ((), ())),
                                preferred_element_type=jnp.float32) * scale
        s = s - jnp.max(s, axis=-1, keepdims=True)
        p = jnp.exp(s)
        p = p * pl.reciprocal(jnp.sum(p, axis=-1, keepdims=True), approx=False)
        ctx_heads.append(jnp.dot(p, v, preferred_element_type=jnp.float32))   # [S, dh]
    ctx = jnp.concatenate(ctx_heads, axis=-1)                          # [S, H]
    # single output projection over all heads
    attn = (jnp.dot(ctx.astype(jnp.bfloat16), wo_ref[0],
                    preferred_element_type=jnp.float32) + bo_ref[0])
    h1 = _ln(attn + h, g1_ref[0], b1_ref[0], eps)                      # post-attn LN
    inter = _gelu(jnp.dot(h1.astype(jnp.bfloat16), wi_ref[0],
                          preferred_element_type=jnp.float32) + bi_ref[0])
    ffn = (jnp.dot(inter.astype(jnp.bfloat16), wf_ref[0],
                   preferred_element_type=jnp.float32) + bff_ref[0])
    h_out = _ln(ffn + h1, g2_ref[0], b2_ref[0], eps)
    h_scratch[...] = h_out

    # ---------- phase 3 (last l): fused BertOnlyMLMHead + output stores ----------
    @pl.when(l == pl.num_programs(1) - 1)
    def _head():
        seq_ref[0] = h_out.astype(seq_ref.dtype)
        tt = (jnp.dot(h_out.astype(jnp.bfloat16), cw_ref[...],
                      preferred_element_type=jnp.float32) + cb_ref[...])
        tt = _ln(_gelu(tt), cg_ref[...], cbeta_ref[...], eps)
        # decoder weight is zero-padded to 128 lanes -> lane-dense vst
        logits_ref[0] = (jnp.dot(tt.astype(jnp.bfloat16), dw_ref[...],
                                 preferred_element_type=jnp.float32)
                         + db_ref[...]).astype(logits_ref.dtype)


# ---------------- forward wrapper (exactly ONE pallas_call) ----------------
def gaussian_diffusion_transformer_forward(params, x, timesteps):
    """Equivalent of GaussianDiffusionTransformer.forward (eval mode, attn_mask=None)."""
    B, S, C = x.shape
    H, L = HIDDEN, NUM_LAYERS
    half = H // 2

    freqs = np.exp(-math.log(10000.0) * np.arange(half, dtype=np.float32) / half)
    freqs_full = jnp.asarray(np.concatenate([freqs, freqs]).reshape(1, H), jnp.float32)
    t_f = timesteps.astype(jnp.float32)                       # [B] scalars -> SMEM
    pos = params["pos_emb"][:S]                                # [S, H]

    # BlockSpec helpers
    full = lambda a: pl.BlockSpec(a.shape, lambda b, l: (0,) * a.ndim)
    perb = lambda shape: pl.BlockSpec(shape, lambda b, l: (b,) + (0,) * (len(shape) - 1))
    perl = lambda a: pl.BlockSpec((1,) + a.shape[1:], lambda b, l: (l,) + (0,) * (a.ndim - 1))

    in_specs = [
        pl.BlockSpec(memory_space=pltpu.MemorySpace.SMEM),     # timesteps (scalars)
        perb((1, S, C)),                                       # x, per-batch block
        full(freqs_full), full(pos),
        full(params["up_w"]), full(params["up_b"]),
        full(params["t_w1"]), full(params["t_b1"]),
        full(params["t_w2"]), full(params["t_b2"]),
        full(params["emb_ln_g"]), full(params["emb_ln_b"]),
        perl(params["wqkv"]), perl(params["bqkv"]),
        perl(params["wo"]), perl(params["bo"]),
        perl(params["ln1_g"]), perl(params["ln1_b"]),
        perl(params["wi"]), perl(params["bi"]),
        perl(params["wf"]), perl(params["bf"]),
        perl(params["ln2_g"]), perl(params["ln2_b"]),
        full(params["cls_w"]), full(params["cls_b"]),
        full(params["cls_ln_g"]), full(params["cls_ln_b"]),
        full(params["dec_w"]), full(params["dec_b"]),
    ]
    out_specs = (perb((1, S, LOGIT_PAD)), perb((1, S, H)))
    out_shape = (jax.ShapeDtypeStruct((B, S, LOGIT_PAD), jnp.float32),
                 jax.ShapeDtypeStruct((B, S, H), jnp.float32))

    logits_pad, seq_out = pl.pallas_call(
        functools.partial(_fused_kernel, seq=S, num_heads=NUM_HEADS,
                          head_dim=HEAD_DIM, hidden=H, eps=LN_EPS,
                          scale_c=math.sqrt(C), half=half),
        grid=(B, L),
        in_specs=in_specs,
        out_specs=out_specs,
        out_shape=out_shape,
        scratch_shapes=[pltpu.VMEM((S, H), jnp.float32)],       # resident activation slab
        compiler_params=pltpu.CompilerParams(
            dimension_semantics=("parallel", "arbitrary")),      # batch || on v7x megacore
    )(t_f, x, freqs_full, pos,
      params["up_w"], params["up_b"], params["t_w1"], params["t_b1"],
      params["t_w2"], params["t_b2"], params["emb_ln_g"], params["emb_ln_b"],
      params["wqkv"], params["bqkv"], params["wo"], params["bo"],
      params["ln1_g"], params["ln1_b"], params["wi"], params["bi"],
      params["wf"], params["bf"], params["ln2_g"], params["ln2_b"],
      params["cls_w"], params["cls_b"], params["cls_ln_g"], params["cls_ln_b"],
      params["dec_w"], params["dec_b"])

    return {"logits": logits_pad[..., :VOCAB], "sequence_output": seq_out}


# ---------------- deterministic parameter init ----------------
def init_params(key):
    keys = iter(jax.random.split(key, 64))
    H, I, L = HIDDEN, INTERMEDIATE, NUM_LAYERS

    def dense(fi, fo, dtype=jnp.bfloat16):
        return (0.02 * jax.random.normal(next(keys), (fi, fo), jnp.float32)).astype(dtype)

    zeros = lambda *s: jnp.zeros(s, jnp.float32)
    ones = lambda *s: jnp.ones(s, jnp.float32)

    def stack(make):
        return jnp.stack([make() for _ in range(L)])             # leading layer axis

    dec_w = jnp.pad(dense(H, VOCAB, jnp.float32),
                    ((0, 0), (0, LOGIT_PAD - VOCAB))).astype(jnp.bfloat16)

    return {
        # embedding path
        "up_w": dense(IN_CHANNELS, H), "up_b": zeros(1, H),
        "t_w1": dense(H, 4 * H), "t_b1": zeros(1, 4 * H),
        "t_w2": dense(4 * H, H), "t_b2": zeros(1, H),
        "pos_emb": 0.02 * jax.random.normal(next(keys), (MAX_POS, H), jnp.float32),
        "emb_ln_g": ones(1, H), "emb_ln_b": zeros(1, H),
        # stacked per-layer BERT weights (bf16 weights, f32 biases / LN params)
        "wqkv": stack(lambda: dense(H, 3 * H)),       # [L, H, 3H]  (q | k | v)
        "bqkv": jnp.zeros((L, 1, 3 * H), jnp.float32),
        "wo": stack(lambda: dense(H, H)),             # [L, H, H]
        "bo": jnp.zeros((L, 1, H), jnp.float32),
        "ln1_g": jnp.ones((L, 1, H), jnp.float32), "ln1_b": jnp.zeros((L, 1, H), jnp.float32),
        "wi": stack(lambda: dense(H, I)), "bi": jnp.zeros((L, 1, I), jnp.float32),
        "wf": stack(lambda: dense(I, H)), "bf": jnp.zeros((L, 1, H), jnp.float32),
        "ln2_g": jnp.ones((L, 1, H), jnp.float32), "ln2_b": jnp.zeros((L, 1, H), jnp.float32),
        # MLM head (decoder padded to 128 lanes for a lane-dense output store)
        "cls_w": dense(H, H), "cls_b": zeros(1, H),
        "cls_ln_g": ones(1, H), "cls_ln_b": zeros(1, H),
        "dec_w": dec_w, "dec_b": zeros(1, LOGIT_PAD),
    }


if __name__ == "__main__":
    key = jax.random.PRNGKey(0)
    pkey, xkey, tkey = jax.random.split(key, 3)
    params = init_params(pkey)

    B, S = 2, 8
    x = jax.random.normal(xkey, (B, S, IN_CHANNELS), jnp.float32)
    timesteps = jax.random.randint(tkey, (B,), 0, 1000).astype(jnp.float32)

    fwd = jax.jit(gaussian_diffusion_transformer_forward)
    out = fwd(params, x, timesteps)
    jax.block_until_ready(out)

    assert out["logits"].shape == (B, S, VOCAB)
    assert out["sequence_output"].shape == (B, S, HIDDEN)
    assert out["logits"].dtype == jnp.float32
    assert bool(jnp.all(jnp.isfinite(out["logits"])))
    assert bool(jnp.all(jnp.isfinite(out["sequence_output"])))
    print("KERNEL_OK")
</pallas_src>

<mosaic_0001>
module attributes {stable_mosaic.version = 11 : i64} {
  func.func @_fused_kernel(%arg0: i32, %arg1: i32, %arg2: memref<2xf32, #tpu.memory_space<smem>>, %arg3: memref<1x8x4xf32, #tpu.memory_space<vmem>>, %arg4: memref<1x32xf32, #tpu.memory_space<vmem>>, %arg5: memref<8x32xf32, #tpu.memory_space<vmem>>, %arg6: memref<4x32xbf16, #tpu.memory_space<vmem>>, %arg7: memref<1x32xf32, #tpu.memory_space<vmem>>, %arg8: memref<32x128xbf16, #tpu.memory_space<vmem>>, %arg9: memref<1x128xf32, #tpu.memory_space<vmem>>, %arg10: memref<128x32xbf16, #tpu.memory_space<vmem>>, %arg11: memref<1x32xf32, #tpu.memory_space<vmem>>, %arg12: memref<1x32xf32, #tpu.memory_space<vmem>>, %arg13: memref<1x32xf32, #tpu.memory_space<vmem>>, %arg14: memref<1x32x96xbf16, #tpu.memory_space<vmem>>, %arg15: memref<1x1x96xf32, #tpu.memory_space<vmem>>, %arg16: memref<1x32x32xbf16, #tpu.memory_space<vmem>>, %arg17: memref<1x1x32xf32, #tpu.memory_space<vmem>>, %arg18: memref<1x1x32xf32, #tpu.memory_space<vmem>>, %arg19: memref<1x1x32xf32, #tpu.memory_space<vmem>>, %arg20: memref<1x32x128xbf16, #tpu.memory_space<vmem>>, %arg21: memref<1x1x128xf32, #tpu.memory_space<vmem>>, %arg22: memref<1x128x32xbf16, #tpu.memory_space<vmem>>, %arg23: memref<1x1x32xf32, #tpu.memory_space<vmem>>, %arg24: memref<1x1x32xf32, #tpu.memory_space<vmem>>, %arg25: memref<1x1x32xf32, #tpu.memory_space<vmem>>, %arg26: memref<32x32xbf16, #tpu.memory_space<vmem>>, %arg27: memref<1x32xf32, #tpu.memory_space<vmem>>, %arg28: memref<1x32xf32, #tpu.memory_space<vmem>>, %arg29: memref<1x32xf32, #tpu.memory_space<vmem>>, %arg30: memref<32x128xbf16, #tpu.memory_space<vmem>>, %arg31: memref<1x128xf32, #tpu.memory_space<vmem>>, %arg32: memref<1x8x128xf32, #tpu.memory_space<vmem>>, %arg33: memref<1x8x32xf32, #tpu.memory_space<vmem>>, %arg34: memref<8x32xf32, #tpu.memory_space<vmem>>) attributes {dimension_semantics = [#tpu.dimension_semantics<parallel>, #tpu.dimension_semantics<arbitrary>], iteration_bounds = array<i64: 2, 2>, scalar_prefetch = 0 : i64, scratch_operands = 1 : i64, tpu.core_type = #tpu.core_type<tc>, window_params = [{transform_indices = @transform_0, window_bounds = array<i64: 2>}, {transform_indices = @transform_1, window_bounds = array<i64: 1, 8, 4>}, {pipeline_mode = #tpu.pipeline_mode<synchronous>, transform_indices = @transform_2, window_bounds = array<i64: 1, 32>}, {pipeline_mode = #tpu.pipeline_mode<synchronous>, transform_indices = @transform_3, window_bounds = array<i64: 8, 32>}, {pipeline_mode = #tpu.pipeline_mode<synchronous>, transform_indices = @transform_4, window_bounds = array<i64: 4, 32>}, {pipeline_mode = #tpu.pipeline_mode<synchronous>, transform_indices = @transform_5, window_bounds = array<i64: 1, 32>}, {pipeline_mode = #tpu.pipeline_mode<synchronous>, transform_indices = @transform_6, window_bounds = array<i64: 32, 128>}, {pipeline_mode = #tpu.pipeline_mode<synchronous>, transform_indices = @transform_7, window_bounds = array<i64: 1, 128>}, {pipeline_mode = #tpu.pipeline_mode<synchronous>, transform_indices = @transform_8, window_bounds = array<i64: 128, 32>}, {pipeline_mode = #tpu.pipeline_mode<synchronous>, transform_indices = @transform_9, window_bounds = array<i64: 1, 32>}, {pipeline_mode = #tpu.pipeline_mode<synchronous>, transform_indices = @transform_10, window_bounds = array<i64: 1, 32>}, {pipeline_mode = #tpu.pipeline_mode<synchronous>, transform_indices = @transform_11, window_bounds = array<i64: 1, 32>}, {transform_indices = @transform_12, window_bounds = array<i64: 1, 32, 96>}, {transform_indices = @transform_13, window_bounds = array<i64: 1, 1, 96>}, {transform_indices = @transform_14, window_bounds = array<i64: 1, 32, 32>}, {transform_indices = @transform_15, window_bounds = array<i64: 1, 1, 32>}, {transform_indices = @transform_16, window_bounds = array<i64: 1, 1, 32>}, {transform_indices = @transform_17, window_bounds = array<i64: 1, 1, 32>}, {transform_indices = @transform_18, window_bounds = array<i64: 1, 32, 128>}, {transform_indices = @transform_19, window_bounds = array<i64: 1, 1, 128>}, {transform_indices = @transform_20, window_bounds = array<i64: 1, 128, 32>}, {transform_indices = @transform_21, window_bounds = array<i64: 1, 1, 32>}, {transform_indices = @transform_22, window_bounds = array<i64: 1, 1, 32>}, {transform_indices = @transform_23, window_bounds = array<i64: 1, 1, 32>}, {pipeline_mode = #tpu.pipeline_mode<synchronous>, transform_indices = @transform_24, window_bounds = array<i64: 32, 32>}, {pipeline_mode = #tpu.pipeline_mode<synchronous>, transform_indices = @transform_25, window_bounds = array<i64: 1, 32>}, {pipeline_mode = #tpu.pipeline_mode<synchronous>, transform_indices = @transform_26, window_bounds = array<i64: 1, 32>}, {pipeline_mode = #tpu.pipeline_mode<synchronous>, transform_indices = @transform_27, window_bounds = array<i64: 1, 32>}, {pipeline_mode = #tpu.pipeline_mode<synchronous>, transform_indices = @transform_28, window_bounds = array<i64: 32, 128>}, {pipeline_mode = #tpu.pipeline_mode<synchronous>, transform_indices = @transform_29, window_bounds = array<i64: 1, 128>}, {transform_indices = @transform_30, window_bounds = array<i64: 1, 8, 128>}, {transform_indices = @transform_31, window_bounds = array<i64: 1, 8, 32>}]} {
    %c0_i32 = arith.constant 0 : i32
    %0 = arith.cmpi eq, %arg1, %c0_i32 : i32
    %1 = arith.extui %0 : i1 to i32
    %c0_i32_0 = arith.constant 0 : i32
    %2 = arith.cmpi ne, %1, %c0_i32_0 : i32
    scf.if %2 {
      %c0_78 = arith.constant 0 : index
      %c0_79 = arith.constant 0 : index
      %c0_80 = arith.constant 0 : index
      %176 = vector.load %arg3[%c0_78, %c0_79, %c0_80] : memref<1x8x4xf32, #tpu.memory_space<vmem>>, vector<1x8x4xf32>
      %177 = vector.shape_cast %176 : vector<1x8x4xf32> to vector<8x4xf32>
      %cst_81 = arith.constant 2.000000e+00 : f32
      %178 = vector.broadcast %cst_81 : f32 to vector<8x4xf32>
      %179 = arith.mulf %178, %177 : vector<8x4xf32>
      %180 = arith.mulf %177, %177 : vector<8x4xf32>
      %cst_82 = arith.constant dense<0.000000e+00> : vector<8xf32>
      %181 = vector.multi_reduction <add>, %180, %cst_82 [1] : vector<8x4xf32> to vector<8xf32>
      %182 = vector.shape_cast %181 : vector<8xf32> to vector<8x1xf32>
      %183 = math.rsqrt %182 : vector<8x1xf32>
      %184 = vector.broadcast %183 : vector<8x1xf32> to vector<8x4xf32>
      %185 = arith.mulf %179, %184 : vector<8x4xf32>
      %186 = arith.truncf %185 : vector<8x4xf32> to vector<8x4xbf16>
      %c0_83 = arith.constant 0 : index
      %c0_84 = arith.constant 0 : index
      %187 = vector.load %arg6[%c0_83, %c0_84] : memref<4x32xbf16, #tpu.memory_space<vmem>>, vector<4x32xbf16>
      %cst_85 = arith.constant dense<0.000000e+00> : vector<8x32xf32>
      %188 = tpu.matmul %186, %187, %cst_85 {dimension_numbers = #tpu.dot_dimension_numbers<[1], [0], [0], [1], [0, 0, 1, 1], [], []>} : vector<8x4xbf16>, vector<4x32xbf16>, vector<8x32xf32> -> vector<8x32xf32>
      %c0_86 = arith.constant 0 : index
      %c0_87 = arith.constant 0 : index
      %189 = vector.load %arg7[%c0_86, %c0_87] : memref<1x32xf32, #tpu.memory_space<vmem>>, vector<1x32xf32>
      %190 = vector.broadcast %189 : vector<1x32xf32> to vector<8x32xf32>
      %191 = arith.addf %188, %190 : vector<8x32xf32>
      %192 = arith.index_cast %arg0 : i32 to index
      %193 = memref.load %arg2[%192] : memref<2xf32, #tpu.memory_space<smem>>
      %c0_88 = arith.constant 0 : index
      %c0_89 = arith.constant 0 : index
      %194 = vector.load %arg4[%c0_88, %c0_89] : memref<1x32xf32, #tpu.memory_space<vmem>>, vector<1x32xf32>
      %195 = vector.broadcast %193 : f32 to vector<1x32xf32>
      %196 = arith.mulf %195, %194 : vector<1x32xf32>
      %197 = tpu.iota {dimensions = array<i32: 1>} : vector<1x32xi32>
      %c16_i32 = arith.constant 16 : i32
      %198 = vector.broadcast %c16_i32 : i32 to vector<1x32xi32>
      %199 = arith.cmpi slt, %197, %198 : vector<1x32xi32>
      %200 = math.cos %196 : vector<1x32xf32>
      %201 = math.sin %196 : vector<1x32xf32>
      %202 = arith.select %199, %200, %201 : vector<1x32xi1>, vector<1x32xf32>
      %203 = arith.truncf %202 : vector<1x32xf32> to vector<1x32xbf16>
      %c0_90 = arith.constant 0 : index
      %c0_91 = arith.constant 0 : index
      %204 = vector.load %arg8[%c0_90, %c0_91] : memref<32x128xbf16, #tpu.memory_space<vmem>>, vector<32x128xbf16>
      %cst_92 = arith.constant dense<0.000000e+00> : vector<1x128xf32>
      %205 = tpu.matmul %203, %204, %cst_92 {dimension_numbers = #tpu.dot_dimension_numbers<[1], [0], [0], [1], [0, 0, 1, 1], [], []>} : vector<1x32xbf16>, vector<32x128xbf16>, vector<1x128xf32> -> vector<1x128xf32>
      %c0_93 = arith.constant 0 : index
      %c0_94 = arith.constant 0 : index
      %206 = vector.load %arg9[%c0_93, %c0_94] : memref<1x128xf32, #tpu.memory_space<vmem>>, vector<1x128xf32>
      %207 = arith.addf %205, %206 : vector<1x128xf32>
      %208 = arith.negf %207 : vector<1x128xf32>
      %209 = math.exp %208 : vector<1x128xf32>
      %cst_95 = arith.constant 1.000000e+00 : f32
      %210 = vector.broadcast %cst_95 : f32 to vector<1x128xf32>
      %211 = arith.addf %210, %209 : vector<1x128xf32>
      %212 = arith.divf %210, %211 : vector<1x128xf32>
      %213 = arith.mulf %207, %212 : vector<1x128xf32>
      %214 = arith.truncf %213 : vector<1x128xf32> to vector<1x128xbf16>
      %c0_96 = arith.constant 0 : index
      %c0_97 = arith.constant 0 : index
      %215 = vector.load %arg10[%c0_96, %c0_97] : memref<128x32xbf16, #tpu.memory_space<vmem>>, vector<128x32xbf16>
      %cst_98 = arith.constant dense<0.000000e+00> : vector<1x32xf32>
      %216 = tpu.matmul %214, %215, %cst_98 {dimension_numbers = #tpu.dot_dimension_numbers<[1], [0], [0], [1], [0, 0, 1, 1], [], []>} : vector<1x128xbf16>, vector<128x32xbf16>, vector<1x32xf32> -> vector<1x32xf32>
      %c0_99 = arith.constant 0 : index
      %c0_100 = arith.constant 0 : index
      %217 = vector.load %arg11[%c0_99, %c0_100] : memref<1x32xf32, #tpu.memory_space<vmem>>, vector<1x32xf32>
      %218 = arith.addf %216, %217 : vector<1x32xf32>
      %c0_101 = arith.constant 0 : index
      %c0_102 = arith.constant 0 : index
      %219 = vector.load %arg5[%c0_101, %c0_102] : memref<8x32xf32, #tpu.memory_space<vmem>>, vector<8x32xf32>
      %220 = arith.addf %191, %219 : vector<8x32xf32>
      %221 = vector.broadcast %218 : vector<1x32xf32> to vector<8x32xf32>
      %222 = arith.addf %220, %221 : vector<8x32xf32>
      %c0_103 = arith.constant 0 : index
      %c0_104 = arith.constant 0 : index
      %223 = vector.load %arg12[%c0_103, %c0_104] : memref<1x32xf32, #tpu.memory_space<vmem>>, vector<1x32xf32>
      %c0_105 = arith.constant 0 : index
      %c0_106 = arith.constant 0 : index
      %224 = vector.load %arg13[%c0_105, %c0_106] : memref<1x32xf32, #tpu.memory_space<vmem>>, vector<1x32xf32>
      %cst_107 = arith.constant dense<0.000000e+00> : vector<8xf32>
      %225 = vector.multi_reduction <add>, %222, %cst_107 [1] : vector<8x32xf32> to vector<8xf32>
      %226 = vector.shape_cast %225 : vector<8xf32> to vector<8x1xf32>
      %cst_108 = arith.constant 3.200000e+01 : f32
      %227 = vector.broadcast %cst_108 : f32 to vector<8x1xf32>
      %228 = arith.divf %226, %227 : vector<8x1xf32>
      %229 = vector.broadcast %228 : vector<8x1xf32> to vector<8x32xf32>
      %230 = arith.subf %222, %229 : vector<8x32xf32>
      %231 = arith.mulf %230, %230 : vector<8x32xf32>
      %cst_109 = arith.constant dense<0.000000e+00> : vector<8xf32>
      %232 = vector.multi_reduction <add>, %231, %cst_109 [1] : vector<8x32xf32> to vector<8xf32>
      %233 = vector.shape_cast %232 : vector<8xf32> to vector<8x1xf32>
      %cst_110 = arith.constant 3.200000e+01 : f32
      %234 = vector.broadcast %cst_110 : f32 to vector<8x1xf32>
      %235 = arith.divf %233, %234 : vector<8x1xf32>
      %236 = vector.broadcast %228 : vector<8x1xf32> to vector<8x32xf32>
      %237 = arith.subf %222, %236 : vector<8x32xf32>
      %cst_111 = arith.constant 9.99999996E-13 : f32
      %238 = vector.broadcast %cst_111 : f32 to vector<8x1xf32>
      %239 = arith.addf %235, %238 : vector<8x1xf32>
      %240 = math.rsqrt %239 : vector<8x1xf32>
      %241 = vector.broadcast %240 : vector<8x1xf32> to vector<8x32xf32>
      %242 = arith.mulf %237, %241 : vector<8x32xf32>
      %243 = vector.broadcast %223 : vector<1x32xf32> to vector<8x32xf32>
      %244 = arith.mulf %242, %243 : vector<8x32xf32>
      %245 = vector.broadcast %224 : vector<1x32xf32> to vector<8x32xf32>
      %246 = arith.addf %244, %245 : vector<8x32xf32>
      %c0_112 = arith.constant 0 : index
      %c0_113 = arith.constant 0 : index
      %247 = vector.load %arg34[%c0_112, %c0_113] : memref<8x32xf32, #tpu.memory_space<vmem>>, vector<8x32xf32>
      tpu.vector_store %arg34[%c0_112, %c0_113], %246 {strides = array<i32>} : memref<8x32xf32, #tpu.memory_space<vmem>>, vector<8x32xf32>,
    } else {
    }
    %c0 = arith.constant 0 : index
    %c0_1 = arith.constant 0 : index
    %3 = vector.load %arg34[%c0, %c0_1] : memref<8x32xf32, #tpu.memory_space<vmem>>, vector<8x32xf32>
    %4 = arith.truncf %3 : vector<8x32xf32> to vector<8x32xbf16>
    %c0_2 = arith.constant 0 : index
    %c0_3 = arith.constant 0 : index
    %c0_4 = arith.constant 0 : index
    %5 = vector.load %arg14[%c0_2, %c0_3, %c0_4] : memref<1x32x96xbf16, #tpu.memory_space<vmem>>, vector<1x32x96xbf16>
    %6 = vector.shape_cast %5 : vector<1x32x96xbf16> to vector<32x96xbf16>
    %cst = arith.constant dense<0.000000e+00> : vector<8x96xf32>
    %7 = tpu.matmul %4, %6, %cst {dimension_numbers = #tpu.dot_dimension_numbers<[1], [0], [0], [1], [0, 0, 1, 1], [], []>} : vector<8x32xbf16>, vector<32x96xbf16>, vector<8x96xf32> -> vector<8x96xf32>
    %c0_5 = arith.constant 0 : index
    %c0_6 = arith.constant 0 : index
    %c0_7 = arith.constant 0 : index
    %8 = vector.load %arg15[%c0_5, %c0_6, %c0_7] : memref<1x1x96xf32, #tpu.memory_space<vmem>>, vector<1x1x96xf32>
    %9 = vector.shape_cast %8 : vector<1x1x96xf32> to vector<1x96xf32>
    %10 = vector.broadcast %9 : vector<1x96xf32> to vector<8x96xf32>
    %11 = arith.addf %7, %10 : vector<8x96xf32>
    %12 = vector.extract_strided_slice %11 {offsets = [0, 0], sizes = [8, 8], strides = [1, 1]} : vector<8x96xf32> to vector<8x8xf32>
    %13 = vector.extract_strided_slice %11 {offsets = [0, 32], sizes = [8, 8], strides = [1, 1]} : vector<8x96xf32> to vector<8x8xf32>
    %14 = vector.extract_strided_slice %11 {offsets = [0, 64], sizes = [8, 8], strides = [1, 1]} : vector<8x96xf32> to vector<8x8xf32>
    %cst_8 = arith.constant dense<0.000000e+00> : vector<8x8xf32>
    %15 = tpu.matmul %12, %13, %cst_8 {dimension_numbers = #tpu.dot_dimension_numbers<[1], [1], [0], [0], [0, 0, 1, 0], [], []>} : vector<8x8xf32>, vector<8x8xf32>, vector<8x8xf32> -> vector<8x8xf32>
    %cst_9 = arith.constant 0.353553385 : f32
    %16 = vector.broadcast %cst_9 : f32 to vector<8x8xf32>
    %17 = arith.mulf %15, %16 : vector<8x8xf32>
    %cst_10 = arith.constant dense<0xFF800000> : vector<8xf32>
    %18 = vector.multi_reduction <maximumf>, %17, %cst_10 [1] : vector<8x8xf32> to vector<8xf32>
    %19 = vector.shape_cast %18 : vector<8xf32> to vector<8x1xf32>
    %20 = vector.broadcast %19 : vector<8x1xf32> to vector<8x8xf32>
    %21 = arith.subf %17, %20 : vector<8x8xf32>
    %22 = math.exp %21 : vector<8x8xf32>
    %cst_11 = arith.constant dense<0.000000e+00> : vector<8xf32>
    %23 = vector.multi_reduction <add>, %22, %cst_11 [1] : vector<8x8xf32> to vector<8xf32>
    %24 = vector.shape_cast %23 : vector<8xf32> to vector<8x1xf32>
    %25 = tpu.reciprocal %24 : vector<8x1xf32> -> vector<8x1xf32>
    %26 = vector.broadcast %25 : vector<8x1xf32> to vector<8x8xf32>
    %27 = arith.mulf %22, %26 : vector<8x8xf32>
    %cst_12 = arith.constant dense<0.000000e+00> : vector<8x8xf32>
    %28 = tpu.matmul %27, %14, %cst_12 {dimension_numbers = #tpu.dot_dimension_numbers<[1], [0], [0], [1], [0, 0, 1, 1], [], []>} : vector<8x8xf32>, vector<8x8xf32>, vector<8x8xf32> -> vector<8x8xf32>
    %29 = vector.extract_strided_slice %11 {offsets = [0, 8], sizes = [8, 8], strides = [1, 1]} : vector<8x96xf32> to vector<8x8xf32>
    %30 = vector.extract_strided_slice %11 {offsets = [0, 40], sizes = [8, 8], strides = [1, 1]} : vector<8x96xf32> to vector<8x8xf32>
    %31 = vector.extract_strided_slice %11 {offsets = [0, 72], sizes = [8, 8], strides = [1, 1]} : vector<8x96xf32> to vector<8x8xf32>
    %cst_13 = arith.constant dense<0.000000e+00> : vector<8x8xf32>
    %32 = tpu.matmul %29, %30, %cst_13 {dimension_numbers = #tpu.dot_dimension_numbers<[1], [1], [0], [0], [0, 0, 1, 0], [], []>} : vector<8x8xf32>, vector<8x8xf32>, vector<8x8xf32> -> vector<8x8xf32>
    %cst_14 = arith.constant 0.353553385 : f32
    %33 = vector.broadcast %cst_14 : f32 to vector<8x8xf32>
    %34 = arith.mulf %32, %33 : vector<8x8xf32>
    %cst_15 = arith.constant dense<0xFF800000> : vector<8xf32>
    %35 = vector.multi_reduction <maximumf>, %34, %cst_15 [1] : vector<8x8xf32> to vector<8xf32>
    %36 = vector.shape_cast %35 : vector<8xf32> to vector<8x1xf32>
    %37 = vector.broadcast %36 : vector<8x1xf32> to vector<8x8xf32>
    %38 = arith.subf %34, %37 : vector<8x8xf32>
    %39 = math.exp %38 : vector<8x8xf32>
    %cst_16 = arith.constant dense<0.000000e+00> : vector<8xf32>
    %40 = vector.multi_reduction <add>, %39, %cst_16 [1] : vector<8x8xf32> to vector<8xf32>
    %41 = vector.shape_cast %40 : vector<8xf32> to vector<8x1xf32>
    %42 = tpu.reciprocal %41 : vector<8x1xf32> -> vector<8x1xf32>
    %43 = vector.broadcast %42 : vector<8x1xf32> to vector<8x8xf32>
    %44 = arith.mulf %39, %43 : vector<8x8xf32>
    %cst_17 = arith.constant dense<0.000000e+00> : vector<8x8xf32>
    %45 = tpu.matmul %44, %31, %cst_17 {dimension_numbers = #tpu.dot_dimension_numbers<[1], [0], [0], [1], [0, 0, 1, 1], [], []>} : vector<8x8xf32>, vector<8x8xf32>, vector<8x8xf32> -> vector<8x8xf32>
    %46 = vector.extract_strided_slice %11 {offsets = [0, 16], sizes = [8, 8], strides = [1, 1]} : vector<8x96xf32> to vector<8x8xf32>
    %47 = vector.extract_strided_slice %11 {offsets = [0, 48], sizes = [8, 8], strides = [1, 1]} : vector<8x96xf32> to vector<8x8xf32>
    %48 = vector.extract_strided_slice %11 {offsets = [0, 80], sizes = [8, 8], strides = [1, 1]} : vector<8x96xf32> to vector<8x8xf32>
    %cst_18 = arith.constant dense<0.000000e+00> : vector<8x8xf32>
    %49 = tpu.matmul %46, %47, %cst_18 {dimension_numbers = #tpu.dot_dimension_numbers<[1], [1], [0], [0], [0, 0, 1, 0], [], []>} : vector<8x8xf32>, vector<8x8xf32>, vector<8x8xf32> -> vector<8x8xf32>
    %cst_19 = arith.constant 0.353553385 : f32
    %50 = vector.broadcast %cst_19 : f32 to vector<8x8xf32>
    %51 = arith.mulf %49, %50 : vector<8x8xf32>
    %cst_20 = arith.constant dense<0xFF800000> : vector<8xf32>
    %52 = vector.multi_reduction <maximumf>, %51, %cst_20 [1] : vector<8x8xf32> to vector<8xf32>
    %53 = vector.shape_cast %52 : vector<8xf32> to vector<8x1xf32>
    %54 = vector.broadcast %53 : vector<8x1xf32> to vector<8x8xf32>
    %55 = arith.subf %51, %54 : vector<8x8xf32>
    %56 = math.exp %55 : vector<8x8xf32>
    %cst_21 = arith.constant dense<0.000000e+00> : vector<8xf32>
    %57 = vector.multi_reduction <add>, %56, %cst_21 [1] : vector<8x8xf32> to vector<8xf32>
    %58 = vector.shape_cast %57 : vector<8xf32> to vector<8x1xf32>
    %59 = tpu.reciprocal %58 : vector<8x1xf32> -> vector<8x1xf32>
    %60 = vector.broadcast %59 : vector<8x1xf32> to vector<8x8xf32>
    %61 = arith.mulf %56, %60 : vector<8x8xf32>
    %cst_22 = arith.constant dense<0.000000e+00> : vector<8x8xf32>
    %62 = tpu.matmul %61, %48, %cst_22 {dimension_numbers = #tpu.dot_dimension_numbers<[1], [0], [0], [1], [0, 0, 1, 1], [], []>} : vector<8x8xf32>, vector<8x8xf32>, vector<8x8xf32> -> vector<8x8xf32>
    %63 = vector.extract_strided_slice %11 {offsets = [0, 24], sizes = [8, 8], strides = [1, 1]} : vector<8x96xf32> to vector<8x8xf32>
    %64 = vector.extract_strided_slice %11 {offsets = [0, 56], sizes = [8, 8], strides = [1, 1]} : vector<8x96xf32> to vector<8x8xf32>
    %65 = vector.extract_strided_slice %11 {offsets = [0, 88], sizes = [8, 8], strides = [1, 1]} : vector<8x96xf32> to vector<8x8xf32>
    %cst_23 = arith.constant dense<0.000000e+00> : vector<8x8xf32>
    %66 = tpu.matmul %63, %64, %cst_23 {dimension_numbers = #tpu.dot_dimension_numbers<[1], [1], [0], [0], [0, 0, 1, 0], [], []>} : vector<8x8xf32>, vector<8x8xf32>, vector<8x8xf32> -> vector<8x8xf32>
    %cst_24 = arith.constant 0.353553385 : f32
    %67 = vector.broadcast %cst_24 : f32 to vector<8x8xf32>
    %68 = arith.mulf %66, %67 : vector<8x8xf32>
    %cst_25 = arith.constant dense<0xFF800000> : vector<8xf32>
    %69 = vector.multi_reduction <maximumf>, %68, %cst_25 [1] : vector<8x8xf32> to vector<8xf32>
    %70 = vector.shape_cast %69 : vector<8xf32> to vector<8x1xf32>
    %71 = vector.broadcast %70 : vector<8x1xf32> to vector<8x8xf32>
    %72 = arith.subf %68, %71 : vector<8x8xf32>
    %73 = math.exp %72 : vector<8x8xf32>
    %cst_26 = arith.constant dense<0.000000e+00> : vector<8xf32>
    %74 = vector.multi_reduction <add>, %73, %cst_26 [1] : vector<8x8xf32> to vector<8xf32>
    %75 = vector.shape_cast %74 : vector<8xf32> to vector<8x1xf32>
    %76 = tpu.reciprocal %75 : vector<8x1xf32> -> vector<8x1xf32>
    %77 = vector.broadcast %76 : vector<8x1xf32> to vector<8x8xf32>
    %78 = arith.mulf %73, %77 : vector<8x8xf32>
    %cst_27 = arith.constant dense<0.000000e+00> : vector<8x8xf32>
    %79 = tpu.matmul %78, %65, %cst_27 {dimension_numbers = #tpu.dot_dimension_numbers<[1], [0], [0], [1], [0, 0, 1, 1], [], []>} : vector<8x8xf32>, vector<8x8xf32>, vector<8x8xf32> -> vector<8x8xf32>
    %80 = tpu.concatenate %28, %45, %62, %79 in 1 : vector<8x8xf32>, vector<8x8xf32>, vector<8x8xf32>, vector<8x8xf32> -> vector<8x32xf32>
    %81 = arith.truncf %80 : vector<8x32xf32> to vector<8x32xbf16>
    %c0_28 = arith.constant 0 : index
    %c0_29 = arith.constant 0 : index
    %c0_30 = arith.constant 0 : index
    %82 = vector.load %arg16[%c0_28, %c0_29, %c0_30] : memref<1x32x32xbf16, #tpu.memory_space<vmem>>, vector<1x32x32xbf16>
    %83 = vector.shape_cast %82 : vector<1x32x32xbf16> to vector<32x32xbf16>
    %cst_31 = arith.constant dense<0.000000e+00> : vector<8x32xf32>
    %84 = tpu.matmul %81, %83, %cst_31 {dimension_numbers = #tpu.dot_dimension_numbers<[1], [0], [0], [1], [0, 0, 1, 1], [], []>} : vector<8x32xbf16>, vector<32x32xbf16>, vector<8x32xf32> -> vector<8x32xf32>
    %c0_32 = arith.constant 0 : index
    %c0_33 = arith.constant 0 : index
    %c0_34 = arith.constant 0 : index
    %85 = vector.load %arg17[%c0_32, %c0_33, %c0_34] : memref<1x1x32xf32, #tpu.memory_space<vmem>>, vector<1x1x32xf32>
    %86 = vector.shape_cast %85 : vector<1x1x32xf32> to vector<1x32xf32>
    %87 = vector.broadcast %86 : vector<1x32xf32> to vector<8x32xf32>
    %88 = arith.addf %84, %87 : vector<8x32xf32>
    %89 = arith.addf %88, %3 : vector<8x32xf32>
    %c0_35 = arith.constant 0 : index
    %c0_36 = arith.constant 0 : index
    %c0_37 = arith.constant 0 : index
    %90 = vector.load %arg18[%c0_35, %c0_36, %c0_37] : memref<1x1x32xf32, #tpu.memory_space<vmem>>, vector<1x1x32xf32>
    %91 = vector.shape_cast %90 : vector<1x1x32xf32> to vector<1x32xf32>
    %c0_38 = arith.constant 0 : index
    %c0_39 = arith.constant 0 : index
    %c0_40 = arith.constant 0 : index
    %92 = vector.load %arg19[%c0_38, %c0_39, %c0_40] : memref<1x1x32xf32, #tpu.memory_space<vmem>>, vector<1x1x32xf32>
    %93 = vector.shape_cast %92 : vector<1x1x32xf32> to vector<1x32xf32>
    %cst_41 = arith.constant dense<0.000000e+00> : vector<8xf32>
    %94 = vector.multi_reduction <add>, %89, %cst_41 [1] : vector<8x32xf32> to vector<8xf32>
    %95 = vector.shape_cast %94 : vector<8xf32> to vector<8x1xf32>
    %cst_42 = arith.constant 3.200000e+01 : f32
    %96 = vector.broadcast %cst_42 : f32 to vector<8x1xf32>
    %97 = arith.divf %95, %96 : vector<8x1xf32>
    %98 = vector.broadcast %97 : vector<8x1xf32> to vector<8x32xf32>
    %99 = arith.subf %89, %98 : vector<8x32xf32>
    %100 = arith.mulf %99, %99 : vector<8x32xf32>
    %cst_43 = arith.constant dense<0.000000e+00> : vector<8xf32>
    %101 = vector.multi_reduction <add>, %100, %cst_43 [1] : vector<8x32xf32> to vector<8xf32>
    %102 = vector.shape_cast %101 : vector<8xf32> to vector<8x1xf32>
    %cst_44 = arith.constant 3.200000e+01 : f32
    %103 = vector.broadcast %cst_44 : f32 to vector<8x1xf32>
    %104 = arith.divf %102, %103 : vector<8x1xf32>
    %105 = vector.broadcast %97 : vector<8x1xf32> to vector<8x32xf32>
    %106 = arith.subf %89, %105 : vector<8x32xf32>
    %cst_45 = arith.constant 9.99999996E-13 : f32
    %107 = vector.broadcast %cst_45 : f32 to vector<8x1xf32>
    %108 = arith.addf %104, %107 : vector<8x1xf32>
    %109 = math.rsqrt %108 : vector<8x1xf32>
    %110 = vector.broadcast %109 : vector<8x1xf32> to vector<8x32xf32>
    %111 = arith.mulf %106, %110 : vector<8x32xf32>
    %112 = vector.broadcast %91 : vector<1x32xf32> to vector<8x32xf32>
    %113 = arith.mulf %111, %112 : vector<8x32xf32>
    %114 = vector.broadcast %93 : vector<1x32xf32> to vector<8x32xf32>
    %115 = arith.addf %113, %114 : vector<8x32xf32>
    %116 = arith.truncf %115 : vector<8x32xf32> to vector<8x32xbf16>
    %c0_46 = arith.constant 0 : index
    %c0_47 = arith.constant 0 : index
    %c0_48 = arith.constant 0 : index
    %117 = vector.load %arg20[%c0_46, %c0_47, %c0_48] : memref<1x32x128xbf16, #tpu.memory_space<vmem>>, vector<1x32x128xbf16>
    %118 = vector.shape_cast %117 : vector<1x32x128xbf16> to vector<32x128xbf16>
    %cst_49 = arith.constant dense<0.000000e+00> : vector<8x128xf32>
    %119 = tpu.matmul %116, %118, %cst_49 {dimension_numbers = #tpu.dot_dimension_numbers<[1], [0], [0], [1], [0, 0, 1, 1], [], []>} : vector<8x32xbf16>, vector<32x128xbf16>, vector<8x128xf32> -> vector<8x128xf32>
    %c0_50 = arith.constant 0 : index
    %c0_51 = arith.constant 0 : index
    %c0_52 = arith.constant 0 : index
    %120 = vector.load %arg21[%c0_50, %c0_51, %c0_52] : memref<1x1x128xf32, #tpu.memory_space<vmem>>, vector<1x1x128xf32>
    %121 = vector.shape_cast %120 : vector<1x1x128xf32> to vector<1x128xf32>
    %122 = vector.broadcast %121 : vector<1x128xf32> to vector<8x128xf32>
    %123 = arith.addf %119, %122 : vector<8x128xf32>
    %124 = arith.mulf %123, %123 : vector<8x128xf32>
    %125 = arith.mulf %123, %124 : vector<8x128xf32>
    %cst_53 = arith.constant 4.471500e-02 : f32
    %126 = vector.broadcast %cst_53 : f32 to vector<8x128xf32>
    %127 = arith.mulf %126, %125 : vector<8x128xf32>
    %128 = arith.addf %123, %127 : vector<8x128xf32>
    %cst_54 = arith.constant 0.797884583 : f32
    %129 = vector.broadcast %cst_54 : f32 to vector<8x128xf32>
    %130 = arith.mulf %129, %128 : vector<8x128xf32>
    %131 = math.tanh %130 : vector<8x128xf32>
    %cst_55 = arith.constant 1.000000e+00 : f32
    %132 = vector.broadcast %cst_55 : f32 to vector<8x128xf32>
    %133 = arith.addf %132, %131 : vector<8x128xf32>
    %cst_56 = arith.constant 5.000000e-01 : f32
    %134 = vector.broadcast %cst_56 : f32 to vector<8x128xf32>
    %135 = arith.mulf %134, %133 : vector<8x128xf32>
    %136 = arith.mulf %123, %135 : vector<8x128xf32>
    %137 = arith.truncf %136 : vector<8x128xf32> to vector<8x128xbf16>
    %c0_57 = arith.constant 0 : index
    %c0_58 = arith.constant 0 : index
    %c0_59 = arith.constant 0 : index
    %138 = vector.load %arg22[%c0_57, %c0_58, %c0_59] : memref<1x128x32xbf16, #tpu.memory_space<vmem>>, vector<1x128x32xbf16>
    %139 = vector.shape_cast %138 : vector<1x128x32xbf16> to vector<128x32xbf16>
    %cst_60 = arith.constant dense<0.000000e+00> : vector<8x32xf32>
    %140 = tpu.matmul %137, %139, %cst_60 {dimension_numbers = #tpu.dot_dimension_numbers<[1], [0], [0], [1], [0, 0, 1, 1], [], []>} : vector<8x128xbf16>, vector<128x32xbf16>, vector<8x32xf32> -> vector<8x32xf32>
    %c0_61 = arith.constant 0 : index
    %c0_62 = arith.constant 0 : index
    %c0_63 = arith.constant 0 : index
    %141 = vector.load %arg23[%c0_61, %c0_62, %c0_63] : memref<1x1x32xf32, #tpu.memory_space<vmem>>, vector<1x1x32xf32>
    %142 = vector.shape_cast %141 : vector<1x1x32xf32> to vector<1x32xf32>
    %143 = vector.broadcast %142 : vector<1x32xf32> to vector<8x32xf32>
    %144 = arith.addf %140, %143 : vector<8x32xf32>
    %145 = arith.addf %144, %115 : vector<8x32xf32>
    %c0_64 = arith.constant 0 : index
    %c0_65 = arith.constant 0 : index
    %c0_66 = arith.constant 0 : index
    %146 = vector.load %arg24[%c0_64, %c0_65, %c0_66] : memref<1x1x32xf32, #tpu.memory_space<vmem>>, vector<1x1x32xf32>
    %147 = vector.shape_cast %146 : vector<1x1x32xf32> to vector<1x32xf32>
    %c0_67 = arith.constant 0 : index
    %c0_68 = arith.constant 0 : index
    %c0_69 = arith.constant 0 : index
    %148 = vector.load %arg25[%c0_67, %c0_68, %c0_69] : memref<1x1x32xf32, #tpu.memory_space<vmem>>, vector<1x1x32xf32>
    %149 = vector.shape_cast %148 : vector<1x1x32xf32> to vector<1x32xf32>
    %cst_70 = arith.constant dense<0.000000e+00> : vector<8xf32>
    %150 = vector.multi_reduction <add>, %145, %cst_70 [1] : vector<8x32xf32> to vector<8xf32>
    %151 = vector.shape_cast %150 : vector<8xf32> to vector<8x1xf32>
    %cst_71 = arith.constant 3.200000e+01 : f32
    %152 = vector.broadcast %cst_71 : f32 to vector<8x1xf32>
    %153 = arith.divf %151, %152 : vector<8x1xf32>
    %154 = vector.broadcast %153 : vector<8x1xf32> to vector<8x32xf32>
    %155 = arith.subf %145, %154 : vector<8x32xf32>
    %156 = arith.mulf %155, %155 : vector<8x32xf32>
    %cst_72 = arith.constant dense<0.000000e+00> : vector<8xf32>
    %157 = vector.multi_reduction <add>, %156, %cst_72 [1] : vector<8x32xf32> to vector<8xf32>
    %158 = vector.shape_cast %157 : vector<8xf32> to vector<8x1xf32>
    %cst_73 = arith.constant 3.200000e+01 : f32
    %159 = vector.broadcast %cst_73 : f32 to vector<8x1xf32>
    %160 = arith.divf %158, %159 : vector<8x1xf32>
    %161 = vector.broadcast %153 : vector<8x1xf32> to vector<8x32xf32>
    %162 = arith.subf %145, %161 : vector<8x32xf32>
    %cst_74 = arith.constant 9.99999996E-13 : f32
    %163 = vector.broadcast %cst_74 : f32 to vector<8x1xf32>
    %164 = arith.addf %160, %163 : vector<8x1xf32>
    %165 = math.rsqrt %164 : vector<8x1xf32>
    %166 = vector.broadcast %165 : vector<8x1xf32> to vector<8x32xf32>
    %167 = arith.mulf %162, %166 : vector<8x32xf32>
    %168 = vector.broadcast %147 : vector<1x32xf32> to vector<8x32xf32>
    %169 = arith.mulf %167, %168 : vector<8x32xf32>
    %170 = vector.broadcast %149 : vector<1x32xf32> to vector<8x32xf32>
    %171 = arith.addf %169, %170 : vector<8x32xf32>
    %c0_75 = arith.constant 0 : index
    %c0_76 = arith.constant 0 : index
    %172 = vector.load %arg34[%c0_75, %c0_76] : memref<8x32xf32, #tpu.memory_space<vmem>>, vector<8x32xf32>
    tpu.vector_store %arg34[%c0_75, %c0_76], %171 {strides = array<i32>} : memref<8x32xf32, #tpu.memory_space<vmem>>, vector<8x32xf32>,
    %c1_i32 = arith.constant 1 : i32
    %173 = arith.cmpi eq, %arg1, %c1_i32 : i32
    %174 = arith.extui %173 : i1 to i32
    %c0_i32_77 = arith.constant 0 : i32
    %175 = arith.cmpi ne, %174, %c0_i32_77 : i32
    scf.if %175 {
      %c0_78 = arith.constant 0 : index
      %c0_79 = arith.constant 0 : index
      %c0_80 = arith.constant 0 : index
      %176 = vector.load %arg33[%c0_78, %c0_79, %c0_80] : memref<1x8x32xf32, #tpu.memory_space<vmem>>, vector<1x8x32xf32>
      %177 = vector.shape_cast %176 : vector<1x8x32xf32> to vector<8x32xf32>
      %178 = vector.shape_cast %171 : vector<8x32xf32> to vector<1x8x32xf32>
      tpu.vector_store %arg33[%c0_78, %c0_79, %c0_80], %178 {strides = array<i32>} : memref<1x8x32xf32, #tpu.memory_space<vmem>>, vector<1x8x32xf32>,
      %179 = arith.truncf %171 : vector<8x32xf32> to vector<8x32xbf16>
      %c0_81 = arith.constant 0 : index
      %c0_82 = arith.constant 0 : index
      %180 = vector.load %arg26[%c0_81, %c0_82] : memref<32x32xbf16, #tpu.memory_space<vmem>>, vector<32x32xbf16>
      %cst_83 = arith.constant dense<0.000000e+00> : vector<8x32xf32>
      %181 = tpu.matmul %179, %180, %cst_83 {dimension_numbers = #tpu.dot_dimension_numbers<[1], [0], [0], [1], [0, 0, 1, 1], [], []>} : vector<8x32xbf16>, vector<32x32xbf16>, vector<8x32xf32> -> vector<8x32xf32>
      %c0_84 = arith.constant 0 : index
      %c0_85 = arith.constant 0 : index
      %182 = vector.load %arg27[%c0_84, %c0_85] : memref<1x32xf32, #tpu.memory_space<vmem>>, vector<1x32xf32>
      %183 = vector.broadcast %182 : vector<1x32xf32> to vector<8x32xf32>
      %184 = arith.addf %181, %183 : vector<8x32xf32>
      %185 = arith.mulf %184, %184 : vector<8x32xf32>
      %186 = arith.mulf %184, %185 : vector<8x32xf32>
      %cst_86 = arith.constant 4.471500e-02 : f32
      %187 = vector.broadcast %cst_86 : f32 to vector<8x32xf32>
      %188 = arith.mulf %187, %186 : vector<8x32xf32>
      %189 = arith.addf %184, %188 : vector<8x32xf32>
      %cst_87 = arith.constant 0.797884583 : f32
      %190 = vector.broadcast %cst_87 : f32 to vector<8x32xf32>
      %191 = arith.mulf %190, %189 : vector<8x32xf32>
      %192 = math.tanh %191 : vector<8x32xf32>
      %cst_88 = arith.constant 1.000000e+00 : f32
      %193 = vector.broadcast %cst_88 : f32 to vector<8x32xf32>
      %194 = arith.addf %193, %192 : vector<8x32xf32>
      %cst_89 = arith.constant 5.000000e-01 : f32
      %195 = vector.broadcast %cst_89 : f32 to vector<8x32xf32>
      %196 = arith.mulf %195, %194 : vector<8x32xf32>
      %197 = arith.mulf %184, %196 : vector<8x32xf32>
      %c0_90 = arith.constant 0 : index
      %c0_91 = arith.constant 0 : index
      %198 = vector.load %arg28[%c0_90, %c0_91] : memref<1x32xf32, #tpu.memory_space<vmem>>, vector<1x32xf32>
      %c0_92 = arith.constant 0 : index
      %c0_93 = arith.constant 0 : index
      %199 = vector.load %arg29[%c0_92, %c0_93] : memref<1x32xf32, #tpu.memory_space<vmem>>, vector<1x32xf32>
      %cst_94 = arith.constant dense<0.000000e+00> : vector<8xf32>
      %200 = vector.multi_reduction <add>, %197, %cst_94 [1] : vector<8x32xf32> to vector<8xf32>
      %201 = vector.shape_cast %200 : vector<8xf32> to vector<8x1xf32>
      %cst_95 = arith.constant 3.200000e+01 : f32
      %202 = vector.broadcast %cst_95 : f32 to vector<8x1xf32>
      %203 = arith.divf %201, %202 : vector<8x1xf32>
      %204 = vector.broadcast %203 : vector<8x1xf32> to vector<8x32xf32>
      %205 = arith.subf %197, %204 : vector<8x32xf32>
      %206 = arith.mulf %205, %205 : vector<8x32xf32>
      %cst_96 = arith.constant dense<0.000000e+00> : vector<8xf32>
      %207 = vector.multi_reduction <add>, %206, %cst_96 [1] : vector<8x32xf32> to vector<8xf32>
      %208 = vector.shape_cast %207 : vector<8xf32> to vector<8x1xf32>
      %cst_97 = arith.constant 3.200000e+01 : f32
      %209 = vector.broadcast %cst_97 : f32 to vector<8x1xf32>
      %210 = arith.divf %208, %209 : vector<8x1xf32>
      %211 = vector.broadcast %203 : vector<8x1xf32> to vector<8x32xf32>
      %212 = arith.subf %197, %211 : vector<8x32xf32>
      %cst_98 = arith.constant 9.99999996E-13 : f32
      %213 = vector.broadcast %cst_98 : f32 to vector<8x1xf32>
      %214 = arith.addf %210, %213 : vector<8x1xf32>
      %215 = math.rsqrt %214 : vector<8x1xf32>
      %216 = vector.broadcast %215 : vector<8x1xf32> to vector<8x32xf32>
      %217 = arith.mulf %212, %216 : vector<8x32xf32>
      %218 = vector.broadcast %198 : vector<1x32xf32> to vector<8x32xf32>
      %219 = arith.mulf %217, %218 : vector<8x32xf32>
      %220 = vector.broadcast %199 : vector<1x32xf32> to vector<8x32xf32>
      %221 = arith.addf %219, %220 : vector<8x32xf32>
      %222 = arith.truncf %221 : vector<8x32xf32> to vector<8x32xbf16>
      %c0_99 = arith.constant 0 : index
      %c0_100 = arith.constant 0 : index
      %223 = vector.load %arg30[%c0_99, %c0_100] : memref<32x128xbf16, #tpu.memory_space<vmem>>, vector<32x128xbf16>
      %cst_101 = arith.constant dense<0.000000e+00> : vector<8x128xf32>
      %224 = tpu.matmul %222, %223, %cst_101 {dimension_numbers = #tpu.dot_dimension_numbers<[1], [0], [0], [1], [0, 0, 1, 1], [], []>} : vector<8x32xbf16>, vector<32x128xbf16>, vector<8x128xf32> -> vector<8x128xf32>
      %c0_102 = arith.constant 0 : index
      %c0_103 = arith.constant 0 : index
      %225 = vector.load %arg31[%c0_102, %c0_103] : memref<1x128xf32, #tpu.memory_space<vmem>>, vector<1x128xf32>
      %226 = vector.broadcast %225 : vector<1x128xf32> to vector<8x128xf32>
      %227 = arith.addf %224, %226 : vector<8x128xf32>
      %c0_104 = arith.constant 0 : index
      %c0_105 = arith.constant 0 : index
      %c0_106 = arith.constant 0 : index
      %228 = vector.load %arg32[%c0_104, %c0_105, %c0_106] : memref<1x8x128xf32, #tpu.memory_space<vmem>>, vector<1x8x128xf32>
      %229 = vector.shape_cast %228 : vector<1x8x128xf32> to vector<8x128xf32>
      %230 = vector.shape_cast %227 : vector<8x128xf32> to vector<1x8x128xf32>
      tpu.vector_store %arg32[%c0_104, %c0_105, %c0_106], %230 {strides = array<i32>} : memref<1x8x128xf32, #tpu.memory_space<vmem>>, vector<1x8x128xf32>,
    } else {
    }
    return
  }
  func.func @transform_0(%arg0: i32, %arg1: i32) -> i32 {
    %c0_i32 = arith.constant 0 : i32
    %c0_i32_0 = arith.constant 0 : i32
    return %c0_i32 : i32
  }
  func.func @transform_1(%arg0: i32, %arg1: i32) -> (i32, i32, i32) {
    %c0_i32 = arith.constant 0 : i32
    %c0_i32_0 = arith.constant 0 : i32
    %c0_i32_1 = arith.constant 0 : i32
    return %arg0, %c0_i32, %c0_i32_0 : i32, i32, i32
  }
  func.func @transform_2(%arg0: i32, %arg1: i32) -> (i32, i32) {
    %c0_i32 = arith.constant 0 : i32
    %c0_i32_0 = arith.constant 0 : i32
    %c0_i32_1 = arith.constant 0 : i32
    return %c0_i32, %c0_i32_0 : i32, i32
  }
  func.func @transform_3(%arg0: i32, %arg1: i32) -> (i32, i32) {
    %c0_i32 = arith.constant 0 : i32
    %c0_i32_0 = arith.constant 0 : i32
    %c0_i32_1 = arith.constant 0 : i32
    return %c0_i32, %c0_i32_0 : i32, i32
  }
  func.func @transform_4(%arg0: i32, %arg1: i32) -> (i32, i32) {
    %c0_i32 = arith.constant 0 : i32
    %c0_i32_0 = arith.constant 0 : i32
    %c0_i32_1 = arith.constant 0 : i32
    return %c0_i32, %c0_i32_0 : i32, i32
  }
  func.func @transform_5(%arg0: i32, %arg1: i32) -> (i32, i32) {
    %c0_i32 = arith.constant 0 : i32
    %c0_i32_0 = arith.constant 0 : i32
    %c0_i32_1 = arith.constant 0 : i32
    return %c0_i32, %c0_i32_0 : i32, i32
  }
  func.func @transform_6(%arg0: i32, %arg1: i32) -> (i32, i32) {
    %c0_i32 = arith.constant 0 : i32
    %c0_i32_0 = arith.constant 0 : i32
    %c0_i32_1 = arith.constant 0 : i32
    return %c0_i32, %c0_i32_0 : i32, i32
  }
  func.func @transform_7(%arg0: i32, %arg1: i32) -> (i32, i32) {
    %c0_i32 = arith.constant 0 : i32
    %c0_i32_0 = arith.constant 0 : i32
    %c0_i32_1 = arith.constant 0 : i32
    return %c0_i32, %c0_i32_0 : i32, i32
  }
  func.func @transform_8(%arg0: i32, %arg1: i32) -> (i32, i32) {
    %c0_i32 = arith.constant 0 : i32
    %c0_i32_0 = arith.constant 0 : i32
    %c0_i32_1 = arith.constant 0 : i32
    return %c0_i32, %c0_i32_0 : i32, i32
  }
  func.func @transform_9(%arg0: i32, %arg1: i32) -> (i32, i32) {
    %c0_i32 = arith.constant 0 : i32
    %c0_i32_0 = arith.constant 0 : i32
    %c0_i32_1 = arith.constant 0 : i32
    return %c0_i32, %c0_i32_0 : i32, i32
  }
  func.func @transform_10(%arg0: i32, %arg1: i32) -> (i32, i32) {
    %c0_i32 = arith.constant 0 : i32
    %c0_i32_0 = arith.constant 0 : i32
    %c0_i32_1 = arith.constant 0 : i32
    return %c0_i32, %c0_i32_0 : i32, i32
  }
  func.func @transform_11(%arg0: i32, %arg1: i32) -> (i32, i32) {
    %c0_i32 = arith.constant 0 : i32
    %c0_i32_0 = arith.constant 0 : i32
    %c0_i32_1 = arith.constant 0 : i32
    return %c0_i32, %c0_i32_0 : i32, i32
  }
  func.func @transform_12(%arg0: i32, %arg1: i32) -> (i32, i32, i32) {
    %c0_i32 = arith.constant 0 : i32
    %c0_i32_0 = arith.constant 0 : i32
    %c0_i32_1 = arith.constant 0 : i32
    return %arg1, %c0_i32, %c0_i32_0 : i32, i32, i32
  }
  func.func @transform_13(%arg0: i32, %arg1: i32) -> (i32, i32, i32) {
    %c0_i32 = arith.constant 0 : i32
    %c0_i32_0 = arith.constant 0 : i32
    %c0_i32_1 = arith.constant 0 : i32
    return %arg1, %c0_i32, %c0_i32_0 : i32, i32, i32
  }
  func.func @transform_14(%arg0: i32, %arg1: i32) -> (i32, i32, i32) {
    %c0_i32 = arith.constant 0 : i32
    %c0_i32_0 = arith.constant 0 : i32
    %c0_i32_1 = arith.constant 0 : i32
    return %arg1, %c0_i32, %c0_i32_0 : i32, i32, i32
  }
  func.func @transform_15(%arg0: i32, %arg1: i32) -> (i32, i32, i32) {
    %c0_i32 = arith.constant 0 : i32
    %c0_i32_0 = arith.constant 0 : i32
    %c0_i32_1 = arith.constant 0 : i32
    return %arg1, %c0_i32, %c0_i32_0 : i32, i32, i32
  }
  func.func @transform_16(%arg0: i32, %arg1: i32) -> (i32, i32, i32) {
    %c0_i32 = arith.constant 0 : i32
    %c0_i32_0 = arith.constant 0 : i32
    %c0_i32_1 = arith.constant 0 : i32
    return %arg1, %c0_i32, %c0_i32_0 : i32, i32, i32
  }
  func.func @transform_17(%arg0: i32, %arg1: i32) -> (i32, i32, i32) {
    %c0_i32 = arith.constant 0 : i32
    %c0_i32_0 = arith.constant 0 : i32
    %c0_i32_1 = arith.constant 0 : i32
    return %arg1, %c0_i32, %c0_i32_0 : i32, i32, i32
  }
  func.func @transform_18(%arg0: i32, %arg1: i32) -> (i32, i32, i32) {
    %c0_i32 = arith.constant 0 : i32
    %c0_i32_0 = arith.constant 0 : i32
    %c0_i32_1 = arith.constant 0 : i32
    return %arg1, %c0_i32, %c0_i32_0 : i32, i32, i32
  }
  func.func @transform_19(%arg0: i32, %arg1: i32) -> (i32, i32, i32) {
    %c0_i32 = arith.constant 0 : i32
    %c0_i32_0 = arith.constant 0 : i32
    %c0_i32_1 = arith.constant 0 : i32
    return %arg1, %c0_i32, %c0_i32_0 : i32, i32, i32
  }
  func.func @transform_20(%arg0: i32, %arg1: i32) -> (i32, i32, i32) {
    %c0_i32 = arith.constant 0 : i32
    %c0_i32_0 = arith.constant 0 : i32
    %c0_i32_1 = arith.constant 0 : i32
    return %arg1, %c0_i32, %c0_i32_0 : i32, i32, i32
  }
  func.func @transform_21(%arg0: i32, %arg1: i32) -> (i32, i32, i32) {
    %c0_i32 = arith.constant 0 : i32
    %c0_i32_0 = arith.constant 0 : i32
    %c0_i32_1 = arith.constant 0 : i32
    return %arg1, %c0_i32, %c0_i32_0 : i32, i32, i32
  }
  func.func @transform_22(%arg0: i32, %arg1: i32) -> (i32, i32, i32) {
    %c0_i32 = arith.constant 0 : i32
    %c0_i32_0 = arith.constant 0 : i32
    %c0_i32_1 = arith.constant 0 : i32
    return %arg1, %c0_i32, %c0_i32_0 : i32, i32, i32
  }
  func.func @transform_23(%arg0: i32, %arg1: i32) -> (i32, i32, i32) {
    %c0_i32 = arith.constant 0 : i32
    %c0_i32_0 = arith.constant 0 : i32
    %c0_i32_1 = arith.constant 0 : i32
    return %arg1, %c0_i32, %c0_i32_0 : i32, i32, i32
  }
  func.func @transform_24(%arg0: i32, %arg1: i32) -> (i32, i32) {
    %c0_i32 = arith.constant 0 : i32
    %c0_i32_0 = arith.constant 0 : i32
    %c0_i32_1 = arith.constant 0 : i32
    return %c0_i32, %c0_i32_0 : i32, i32
  }
  func.func @transform_25(%arg0: i32, %arg1: i32) -> (i32, i32) {
    %c0_i32 = arith.constant 0 : i32
    %c0_i32_0 = arith.constant 0 : i32
    %c0_i32_1 = arith.constant 0 : i32
    return %c0_i32, %c0_i32_0 : i32, i32
  }
  func.func @transform_26(%arg0: i32, %arg1: i32) -> (i32, i32) {
    %c0_i32 = arith.constant 0 : i32
    %c0_i32_0 = arith.constant 0 : i32
    %c0_i32_1 = arith.constant 0 : i32
    return %c0_i32, %c0_i32_0 : i32, i32
  }
  func.func @transform_27(%arg0: i32, %arg1: i32) -> (i32, i32) {
    %c0_i32 = arith.constant 0 : i32
    %c0_i32_0 = arith.constant 0 : i32
    %c0_i32_1 = arith.constant 0 : i32
    return %c0_i32, %c0_i32_0 : i32, i32
  }
  func.func @transform_28(%arg0: i32, %arg1: i32) -> (i32, i32) {
    %c0_i32 = arith.constant 0 : i32
    %c0_i32_0 = arith.constant 0 : i32
    %c0_i32_1 = arith.constant 0 : i32
    return %c0_i32, %c0_i32_0 : i32, i32
  }
  func.func @transform_29(%arg0: i32, %arg1: i32) -> (i32, i32) {
    %c0_i32 = arith.constant 0 : i32
    %c0_i32_0 = arith.constant 0 : i32
    %c0_i32_1 = arith.constant 0 : i32
    return %c0_i32, %c0_i32_0 : i32, i32
  }
  func.func @transform_30(%arg0: i32, %arg1: i32) -> (i32, i32, i32) {
    %c0_i32 = arith.constant 0 : i32
    %c0_i32_0 = arith.constant 0 : i32
    %c0_i32_1 = arith.constant 0 : i32
    return %arg0, %c0_i32, %c0_i32_0 : i32, i32, i32
  }
  func.func @transform_31(%arg0: i32, %arg1: i32) -> (i32, i32, i32) {
    %c0_i32 = arith.constant 0 : i32
    %c0_i32_0 = arith.constant 0 : i32
    %c0_i32_1 = arith.constant 0 : i32
    return %arg0, %c0_i32, %c0_i32_0 : i32, i32, i32
  }
}

</mosaic_0001>

<bundles_post_ra>
// kernel: gaussian_diffusion_transformer_forward.1
= control target key start
LH: loop header
LB: loop body
LE: loop exit
PB: predicated region body
PF: predicated region fallthrough
CT: control target
= control target key end

     0   :  { %s3297_s6 = smov 1   ;;  %s3298_s10 = smov 2   ;;  %s3904_s0 = inlined_call_operand.smem [shape: u32[32], index: -1, kind: input, shape index: {}] }
   0x1   :  { %s3360_s5 = sld [smem:[%s3904_s0]]   ;;  %s3299_s14 = smov 3  }
   0x2   :  { %s3365_s9 = sld [smem:[%s3904_s0 + %s3297_s6]]   ;;  %s3300_s18 = smov 4  }
   0x3   :  { %s3370_s13 = sld [smem:[%s3904_s0 + %s3298_s10]]   ;;  %s3301_s22 = smov 5  }
   0x4   :  { %s3375_s17 = sld [smem:[%s3904_s0 + %s3299_s14]]   ;;  %s3302_s26 = smov 6  }
   0x5   :  { %s3380_s21 = sld [smem:[%s3904_s0 + %s3300_s18]]   ;;  %s3303_s30 = smov 7  }
   0x6   :  { %s3385_s25 = sld [smem:[%s3904_s0 + %s3301_s22]]   ;;  %s3304_s4 = smov 8  }
   0x7   :  { %3927 = sst [smem:[#allocation12_spill]] %s3360_s5  ;;  %s3305_s10 = smov 9  }
   0x8   :  { %3928 = sst [smem:[#allocation13_spill]] %s3365_s9  ;;  %s3306_s15 = smov 10  }
   0x9   :  { %3929 = sst [smem:[#allocation14_spill]] %s3370_s13  ;;  %s3307_s20 = smov 11  }
   0xa   :  { %3930 = sst [smem:[#allocation15_spill]] %s3375_s17  ;;  %s3309_s1 = smov 13  }
   0xb   :  { %3931 = sst [smem:[#allocation16_spill]] %s3380_s21  ;;  %s3310_s7 = smov 14  }
   0xc   :  { %3932 = sst [smem:[#allocation17_spill]] %s3385_s25  ;;  %s3312_s22 = smov 16  }
   0xd   :  { %s3390_s29 = sld [smem:[%s3904_s0 + %s3302_s26]]   ;;  %s3308_s26 = smov 12  }
   0xe   :  { %s3395_s3 = sld [smem:[%s3904_s0 + %s3303_s30]]   ;;  %s3313_s28 = smov 17  }
   0xf   :  { %s3400_s8 = sld [smem:[%s3904_s0 + %s3304_s4]]  }
  0x10   :  { %s3405_s14 = sld [smem:[%s3904_s0 + %s3305_s10]]  }
  0x11   :  { %s3410_s19 = sld [smem:[%s3904_s0 + %s3306_s15]]   ;;  %s3311_s15 = smov 15  }
  0x12   :  { %s3415_s24 = sld [smem:[%s3904_s0 + %s3307_s20]]  }
  0x13   :  { %3933 = sst [smem:[#allocation18_spill]] %s3390_s29 }
  0x14   :  { %3934 = sst [smem:[#allocation19_spill]] %s3395_s3 }
  0x15   :  { %3935 = sst [smem:[#allocation20_spill]] %s3400_s8 }
  0x16   :  { %3936 = sst [smem:[#allocation21_spill]] %s3405_s14 }
  0x17   :  { %3937 = sst [smem:[#allocation22_spill]] %s3410_s19 }
  0x18   :  { %3938 = sst [smem:[#allocation23_spill]] %s3415_s24 }
  0x19   :  { %s3420_s30 = sld [smem:[%s3904_s0 + %s3308_s26]]  }
  0x1a   :  { %s3425_s6 = sld [smem:[%s3904_s0 + %s3309_s1]]  }
  0x1b   :  { %s3430_s12 = sld [smem:[%s3904_s0 + %s3310_s7]]   ;;  %s3314_s7 = smov 18  }
  0x1c   :  { %s3435_s20 = sld [smem:[%s3904_s0 + %s3311_s15]]   ;;  %s3315_s15 = smov 19  }
  0x1d   :  { %s3440_s27 = sld [smem:[%s3904_s0 + %s3312_s22]]   ;;  %s3316_s22 = smov 20  }
  0x1e   :  { %s3445_s4 = sld [smem:[%s3904_s0 + %s3313_s28]]   ;;  %s3317_s28 = smov 21  }
  0x1f   :  { %3939 = sst [smem:[#allocation24_spill]] %s3420_s30 }
  0x20   :  { %s3450_s24 = sld [smem:[%s3904_s0 + %s3314_s7]]   ;;  %s3318_s7 = smov 22  }
  0x21   :  { %s3455_s19 = sld [smem:[%s3904_s0 + %s3315_s15]]   ;;  %s3319_s15 = smov 23  }
  0x22   :  { %s3460_s17 = sld [smem:[%s3904_s0 + %s3316_s22]]   ;;  %s3320_s22 = smov 24  }
  0x23   :  { %s3465_s14 = sld [smem:[%s3904_s0 + %s3317_s28]]   ;;  %s3321_s28 = smov 25  }
  0x24   :  { %s3470_s25 = sld [smem:[%s3904_s0 + %s3318_s7]]   ;;  %s3322_s7 = smov 26  }
  0x25   :  { %s3475_s3 = sld [smem:[%s3904_s0 + %s3319_s15]]   ;;  %s3323_s15 = smov 27  }
  0x26   :  { %s3480_s21 = sld [smem:[%s3904_s0 + %s3320_s22]]   ;;  %s3324_s22 = smov 28  }
  0x27   :  { %s3485_s8 = sld [smem:[%s3904_s0 + %s3321_s28]]   ;;  %s3325_s28 = smov 29  }
  0x28   :  { %s3490_s13 = sld [smem:[%s3904_s0 + %s3322_s7]]   ;;  %s3326_s7 = smov 30  }
  0x29   :  { %s3495_s29 = sld [smem:[%s3904_s0 + %s3323_s15]]   ;;  %s3327_s15 = smov 31  }
  0x2c   :  { %3940 = sst [smem:[#allocation25_spill]] %s3480_s21 }
  0x2d   :  { %3941 = sst [smem:[#allocation26_spill]] %s3485_s8 }
  0x2e   :  { %3942 = sst [smem:[#allocation27_spill]] %s3490_s13 }
  0x2f   :  { %3943 = sst [smem:[#allocation28_spill]] %s3495_s29 }
  0x30   :  { %s3500_s21 = sld [smem:[%s3904_s0 + %s3324_s22]]  }
  0x31   :  { %s3505_s8 = sld [smem:[%s3904_s0 + %s3325_s28]]  }
  0x32   :  { %s3510_s13 = sld [smem:[%s3904_s0 + %s3326_s7]]  }
  0x33   :  { %s3515_s29 = sld [smem:[%s3904_s0 + %s3327_s15]]  }
  0x36   :  { %3944 = sst [smem:[#allocation29_spill]] %s3500_s21 }
  0x37   :  { %3945 = sst [smem:[#allocation30_spill]] %s3505_s8 }
  0x38   :  { %3946 = sst [smem:[#allocation31_spill]] %s3510_s13 }
  0x39   :  { %3947 = sst [smem:[#allocation32_spill]] %s3515_s29 }
  0x3a   :  { %69 = vsyncpa [#allocation5], 0 }
  0x3b   :  { %70 = vsyncpa [#allocation4], 0 }
  0x3c   :  { %72 = vsyncpa [#allocation4 + $0x1], 0 }
  0x3d   :  { %73 = vsyncpa [#allocation8], 0 }
  0x3e   :  { %75 = vsyncpa [#allocation8 + $0x1], 0  ;;  %s3517_s22 = smov 0   ;;  %s3519_s23 = smov 0  }
  0x3f   :  { %s3521_s26 = smov 0   ;;  %s3523_s28 = smov 0  }
  0x40   :  { %s3525_s1 = smov 0   ;;  %s3527_s2 = smov 0  }
  0x41   :  { %s3529_s7 = smov 0   ;;  %s3531_s0 = smov 0  }
  0x42 LB: > { %s3948_s5 = sld [smem:[#allocation12_spill]]  ;;  %s2760_s10 = sadd.s32 4294967295, %s3295_s0   ;;  %s3267_s22 = sphi %s3517_s22, %s4002_s22   ;;  %s3295_s0 = sphi %s3531_s0, %s81_s0   ;;  %s3291_s7 = sphi %s3529_s7, %s4008_s7   ;;  %s3287_s2 = sphi %s3527_s2, %s4007_s2   ;;  %s3283_s1 = sphi %s3525_s1, %s4006_s1   ;;  %s3279_s28 = sphi %s3523_s28, %s4005_s28   ;;  %s3275_s26 = sphi %s3521_s26, %s4004_s26   ;;  %s3271_s23 = sphi %s3519_s23, %s4003_s23  }
  0x43   : > { %3949 = sst [smem:[#allocation33_spill]] %s3267_s22  ;;  %s2761_s11 = sadd.s32 4294967294, %s3295_s0  }
  0x44   : > { %3950 = sst [smem:[#allocation34_spill]] %s3271_s23  ;;  %s90_s15 = sadd.s32 1, %s3287_s2 }
  0x45   : > { %3951 = sst [smem:[#allocation35_spill]] %s3275_s26  ;;  %s93_s16 = sadd.s32 1, %s3291_s7 }
  0x46   : > { %3952 = sst [smem:[#allocation36_spill]] %s3279_s28  ;;  %p91_p0 = scmp.ge.s32.totalorder %s90_s15, 2 }
  0x47   : > { %3953 = sst [smem:[#allocation37_spill]] %s3283_s1  ;;  %s795_s18 = sadd.s32 1, %s3275_s26 }
  0x48   : > { %3954 = sst [smem:[#allocation38_spill]] %s3287_s2  ;;  %p805_p1 = scmp.ne.s32.totalorder %s3275_s26, %s3271_s23 }
  0x49   : > { %3955 = sst [smem:[#allocation39_spill]] %s3291_s7  ;;  %p806_p2 = scmp.eq.s32.totalorder %s2760_s10, 3 }
  0x4a   : > { %3956 = sst [smem:[#allocation40_spill]] %s3295_s0  ;;  %s4010_s15 = smov (%p91_p0, %s90_s15), 0 }
  0x4b   : > { %3957 = sst [smem:[#allocation41_spill]] %s4010_s15  ;;  %s4012_s16 = smov (!%p91_p0, %s93_s16), %s3291_s7 }
  0x4c   : > { %p3567_p3 = por %p806_p2, %p805_p1  ;;  %p811_p4 = scmp.ne.s32.totalorder %s3271_s23, %s3267_s22 }
  0x4d   : > { %p95_p5 = scmp.ge.s32.totalorder %s4012_s16, 2  ;;  %p812_p6 = scmp.eq.s32.totalorder %s2761_s11, 3 }
  0x4e   : > { %s3958_s29 = scalar_select %p3567_p3, 1, 0 }
  0x4f   : > { %p2762_p7 = scmp.ge.s32.totalorder %s3295_s0, 1  ;;  %p845_p8 = scmp.lt.s32.totalorder %s3295_s0, 5 }
  0x50   : > { %3959 = sst [smem:[#allocation42_spill]] %s3958_s29  ;;  %s4014_s16 = smov (%p95_p5, %s4012_s16), 0 }
  0x51   : > { %3960 = sst [smem:[#allocation43_spill]] %s4014_s16  ;;  %p3577_p9 = por %p812_p6, %p811_p4 }
  0x52   : > { %p3581_p10 = pnand %p2762_p7, %p845_p8  ;;  %s792_s13 = ssub.s32 %s3291_s7, %s4014_s16 }
  0x53   : > { %s3961_s2 = scalar_select %p3577_p9, 1, 0 }
  0x54   : > { %p793_p11 = scmp.eq.s32.totalorder %s792_s13, 0  ;;  %p2964_p12 = pneg %p3581_p10 }
  0x55   : > { %3962 = sst [smem:[#allocation44_spill]] %s3961_s2  ;;  %p3589_p13 = scmp.eq.s32.totalorder %s2760_s10, 0 }
  0x56   : > { %s857_s22 = sshll.u32 %s3948_s5, 4  ;;  %s3157_s10 = scalar_lea.vmem %s3948_s5, 1  ;;  %s858_s22 = int_to_ptr.vmem [resolvable:$true] %s857_s22 }
  0x57   : > { %s3595_s0 = scalar_select %p793_p11, %s3275_s26, %s795_s18  }
  0x58   : > { %p3599_p0 = pnand %p3589_p13, %p2964_p12  ;;  %s3150_s16 = sshra.s32 %s858_s22, 4  ;;  %s3151_s16 = int_to_ptr.vmem [resolvable:$true] %s3150_s16 }
  0x59   : > { %3965 = sst [smem:[#allocation45_spill]] %s3595_s0  ;;  %s3152_s13 = scalar_lea.vmem %s3151_s16, 1 }
  0x5a   : > { %p3153_p1 = scmp.ne.s32.totalorder %s3151_s16, %s3152_s13  ;;  %p3154_p2 = pneg %p3599_p0 }
  0x5b   : > { %p3158_p6 = scmp.lt.s32.totalorder %s3151_s16, %s3948_s5  ;;  %p3159_p7 = scmp.lt.s32.totalorder %s3157_s10, %s3152_s13 }
  0x5c   : > { %p3155_p4 = pnand %p3154_p2, %p3153_p1 }
  0x5d   : > { %p3160_p8 = por %p3159_p7, %p3158_p6 }
  0x5e   : > { %p3156_p5 = pneg %p3155_p4 }
  0x60   : > { %p3161_p11 = pnand %p3160_p8, %p3156_p5 }
  0x62   : > { %3164 = shalt.err (!%p3161_p11)
}
  0x63   : > { %s3328_s18 = smov [#allocation3]   ;;  %1005 = sbr.rel (%p3581_p10) target bundleno = 3677 (0xe5d), region = 140 }
  0x64   : > { %2967 = dma.vmem_to_smem (!%p3599_p0), %s858_s22, 16, %s3328_s18, [#allocation5]  }
  0x68   : > { %3254 = dma.done.wait (%p3589_p13), [#allocation5], 16  }
  0x69   : > { %3256 = vsyncadd (%p3589_p13), [#allocation5], 4294967280 }
  0x6a   : > { %1012 = sfence }
  0x6b   : > { %s3967_s9 = sld [smem:[#allocation13_spill]]  ;;  %s3616_s22 = sand.u32 1, %s3271_s23  }
  0x6c   : > { %s3968_s30 = sld [smem:[#allocation24_spill]]  ;;  %p1135_p10 = scmp.lt.s32.totalorder %s3283_s1, 1 }
  0x6d   : > { %3969 = sst [smem:[#allocation46_spill]] %s3616_s22  ;;  %s2767_s2 = sshll.u32 %s3616_s22, 3 }
  0x6e   : > { %p1139_p12 = scmp.lt.s32.totalorder %s3279_s28, 1 }
  0x6f   : > { %s1136_s15 = scalar_select %p1135_p10, %s3283_s1, 1 }
  0x70   : > { %s3623_s16 = scalar_select %p1139_p12, %s3279_s28, 1 }
  0x71   : > { %s2769_s11 = sshll.u32 %s1136_s15, 3 }
  0x72   : > { %s3626_s13 = scalar_lea.vmem %s3967_s9, %s2769_s11  ;;  %s2924_s10 = sshll.u32 %s3623_s16, 4 }
  0x73   : > { %s3630_s18 = scalar_lea.vmem %s3968_s30, %s2924_s10  ;;  %s3635_s7 = scalar_lea.vmem %s3430_s12, %s2924_s10 }
  0x74   : > { %s1157_s26 = scalar_lea.vmem %s3440_s27, %s3623_s16  ;;  %s3644_s29 = scalar_lea.vmem %s3450_s24, %s2924_s10 }
  0x75   : > { %s1168_s22 = scalar_lea.vmem %s3455_s19, %s3623_s16  ;;  %s2927_s8 = sshll.u32 %s3623_s16, 6 }
  0x76   : > { %s1176_s21 = scalar_lea.vmem %s3465_s14, %s3623_s16  ;;  %s3652_s1 = scalar_lea.vmem %s3460_s17, %s2927_s8 }
  0x77   : > { %s1179_s28 = scalar_lea.vmem %s3470_s25, %s3623_s16  ;;  %s1182_s15 = scalar_lea.vmem %s3475_s3, %s3623_s16 }
  0x78   : > { %s3658_s11 = scalar_lea.vmem [#allocation6], %s2767_s2  ;;  %s3660_s9 = scalar_lea.vmem [#allocation7], %s2767_s2 }
  0x79   : > { %s3970_s30 = sld [smem:[#allocation36_spill]] }
  0x7f   : > { %p2778_p13 = scmp.ne.s32.totalorder %s3970_s30, 0 }
  0x80   : > { %s3971_s5 = sld [smem:[#allocation18_spill]] (!%p2778_p13) }
  0x81   : > { %1187 = sbr.rel (%p2778_p13) target bundleno = 810 (0x32a), region = 148  ;;  %s3972_s0 = sld [smem:[#allocation37_spill]] (!%p2778_p13) }
  0x82   : > { %s3973_s23 = sld [smem:[#allocation14_spill]] (!%p2778_p13) }
  0x83   : > { %s3974_s8 = sld [smem:[#allocation20_spill]] (!%p2778_p13) }
  0x84   : > { %s3975_s30 = sld [smem:[#allocation16_spill]] (!%p2778_p13) }
  0x85   : > { %s3978_s2 = sld [smem:[#allocation21_spill]] (!%p2778_p13) }
  0x86   : > { %v2929_v0 = vld [vmem:[%s3971_s5 + $0x8] sm:$0xff]  ;;  %v2928_v1 = vld [vmem:[%s3971_s5] sm:$0xff]  ;;  %v3329_v16 = vmov 683565275   ;;  %v3330_v18 = vmov 2475754826  }
  0x87   : > { %s1232_s10 = sld [smem:[#allocation3 + %s3972_s0]]  ;;  %1577 = vmatpush.bf16.msra.mxu1 %v2929_v0  ;;  %v3331_v20 = vmov 2131351028   ;;  %v3332_v22 = vmov 2102212464   ;;  %vm1191_vm12 = vcmask 31744  }
  0x88   : > { %v1233_v2 = vld [vmem:[%s3973_s23] sm:$0x1]  ;;  %v3333_v24 = vmov 920167782   ;;  %v3334_v30 = vmov 1326507024  }
  0x89   : > { %s3976_s23 = sld [smem:[#allocation19_spill]] }
  0x8a   : > { %s3977_s0 = sld [smem:[#allocation17_spill]] }
  0x8b   : > { %1578 = vmatpush.bf16.msra.mxu1 %v2928_v1 }
  0x8d   : > { %v1234_v3 = vstv %s1232_s10  ;;  %s3980_s10 = sld [smem:[#allocation22_spill]] }
  0x8e   : > { %v3667_v4 = vmul.f32 %v1234_v3, %v1233_v2 }
  0x90   : > { %v1242_v5 = vand.u32 2139095040, %v3667_v4  ;;  %v1239_v7 = vand.u32 2147483647, %v3667_v4  ;;  %vm1241_vm13 = vcmp.lt.s32.totalorder %v3667_v4, 0 }
  0x92   : > { %v1243_v6 = vshrl.u32 %v1242_v5, 23  ;;  %v1246_v10 = vand.u32 8388607, %v1239_v7  ;;  %v3335_v5 = vmov 0   ;;  %vm1240_vm14 = vcmp.le.f32.partialorder %v1239_v7, 0.7853982 }
  0x93   : > { %v1236_v7 = vlaneseq }
  0x94   : > { %v2780_v8 = vadd.s32 4294967169, %v1243_v6  ;;  %v1247_v13 = vor.u32 8388608, %v1246_v10 }
  0x96   : > { %v1249_v9 = vadd.s32 1, %v2780_v8  ;;  %v3676_v32 = vshll.u32 %v1247_v13, 8 }
  0x98   : > { %vm1250_vm0 = vcmp.gt.s32.totalorder %v1249_v9, 0  ;;  %v1288_v44 = vand.u32 65535, %v3676_v32  ;;  %v1289_v45 = vshrl.u32 %v3676_v32, 16 }
  0x99   : > { %v1251_v11 = vsel %vm1250_vm0, %v1249_v9, 0 }
  0x9a   : > { %v1253_v12 = vand.u32 31, %v1251_v11  ;;  %v3673_v14 = vshrl.u32 %v1251_v11, 5 }
  0x9c   : > { %v1254_v15 = vsub.s32 32, %v1253_v12  ;;  %v1256_v17 = vshll.u32 %v3329_v16, %v1253_v12  ;;  %v1259_v19 = vshll.u32 %v3330_v18, %v1253_v12  ;;  %v1262_v21 = vshll.u32 %v3331_v20, %v1253_v12 }
  0x9d   : > { %v1265_v23 = vshll.u32 %v3332_v22, %v1253_v12  ;;  %v1268_v25 = vshll.u32 %v3333_v24, %v1253_v12  ;;  %vm1271_vm1 = vcmp.lt.s32.totalorder %v3673_v14, 1  ;;  %vm1274_vm2 = vcmp.lt.s32.totalorder %v3673_v14, 4 }
  0x9e   : > { %v1257_v26 = vshrl.u32 %v3330_v18, %v1254_v15  ;;  %v1260_v27 = vshrl.u32 %v3331_v20, %v1254_v15  ;;  %v1263_v28 = vshrl.u32 %v3332_v22, %v1254_v15  ;;  %v1266_v29 = vshrl.u32 %v3333_v24, %v1254_v15 }
  0x9f   : > { %v1269_v31 = vshrl.u32 %v3334_v30, %v1254_v15  ;;  %vm1273_vm3 = vcmp.lt.s32.totalorder %v3673_v14, 3  ;;  %vm1272_vm4 = vcmp.lt.s32.totalorder %v3673_v14, 2  ;;  %v1255_v52 = vshrl.u32 %v3329_v16, %v1254_v15 }
  0xa0   : > { %v1258_v33 = vor.u32 %v1257_v26, %v1256_v17  ;;  %v1261_v34 = vor.u32 %v1260_v27, %v1259_v19  ;;  %v1264_v35 = vor.u32 %v1263_v28, %v1262_v21  ;;  %v1267_v36 = vor.u32 %v1266_v29, %v1265_v23 }
  0xa1   : > { %v1270_v37 = vor.u32 %v1269_v31, %v1268_v25 }
  0xa2   : > { %v1279_v38 = vsel %vm1271_vm1, %v1258_v33, %v1261_v34  ;;  %v1283_v39 = vsel %vm1271_vm1, %v1261_v34, %v1264_v35  ;;  %v1280_v40 = vsel %vm1274_vm2, %v1267_v36, 920167782  ;;  %v1275_v1 = vsel %vm1271_vm1, %v1255_v52, %v1258_v33 }
  0xa3   : > { %v1284_v41 = vsel %vm1274_vm2, %v1270_v37, 1326507024  ;;  %v1281_v42 = vsel %vm1273_vm3, %v1264_v35, %v1280_v40  ;;  %v1276_v3 = vsel %vm1274_vm2, %v1264_v35, 2102212464 }
  0xa4   : > { %v1285_v43 = vsel %vm1273_vm3, %v1267_v36, %v1284_v41  ;;  %v1282_v46 = vsel %vm1272_vm4, %v1279_v38, %v1281_v42  ;;  %v1277_v16 = vsel %vm1273_vm3, %v1261_v34, %v1276_v3 }
  0xa5   : > { %v1286_v47 = vsel %vm1272_vm4, %v1283_v39, %v1285_v43  ;;  %v1312_v50 = vand.u32 65535, %v1282_v46  ;;  %v1313_v51 = vshrl.u32 %v1282_v46, 16  ;;  %v1278_v24 = vsel %vm1272_vm4, %v1275_v1, %v1277_v16 }
  0xa6   : > { %v1290_v48 = vand.u32 65535, %v1286_v47  ;;  %v1291_v49 = vshrl.u32 %v1286_v47, 16  ;;  %v1332_v28 = vmul.u32 %v3676_v32, %v1278_v24  ;;  %v1237_v16 = vand.u32 127, %v1236_v7 }
  0xa7   : > { %v1314_v56 = vmul.u32 %v1312_v50, %v1288_v44  ;;  %v1315_v57 = vmul.u32 %v1313_v51, %v1288_v44  ;;  %v1316_v58 = vmul.u32 %v1312_v50, %v1289_v45  ;;  %v1317_v62 = vmul.u32 %v1313_v51, %v1289_v45  ;;  %v3709_v51 = vld [vmem:[%s3626_s13] sm:$0xff]  ;;  %s3979_s13 = sld [smem:[#allocation15_spill]] }
  0xa8   : > { %v1292_v53 = vmul.u32 %v1290_v48, %v1288_v44  ;;  %v1293_v54 = vmul.u32 %v1291_v49, %v1288_v44  ;;  %v1294_v55 = vmul.u32 %v1290_v48, %v1289_v45  ;;  %v1295_v59 = vmul.u32 %v1291_v49, %v1289_v45 }
  0xa9   : > { %v1318_v63 = vshll.u32 %v1315_v57, 16  ;;  %v1320_v0 = vshll.u32 %v1316_v58, 16  ;;  %v1319_v13 = vshrl.u32 %v1315_v57, 16  ;;  %v1321_v20 = vshrl.u32 %v1316_v58, 16 }
  0xaa   : > { %v1296_v60 = vshll.u32 %v1293_v54, 16  ;;  %v1298_v61 = vshll.u32 %v1294_v55, 16  ;;  %v1297_v9 = vshrl.u32 %v1293_v54, 16  ;;  %v1299_v17 = vshrl.u32 %v1294_v55, 16 }
  0xab   : > { %vm1322_vm6 = vc.u32 %v1314_v56, %v1318_v63  ;;  %v1324_v8 = vadd.s32 %v1318_v63, %v1314_v56  ;;  %v1190_v52 = vmul.f32 %v3709_v51, %v3709_v51 }
  0xac   : > { %vm1300_vm5 = vc.u32 %v1292_v53, %v1296_v60  ;;  %v1302_v2 = vadd.s32 %v1296_v60, %v1292_v53  ;;  %v1323_v11 = vsel %vm1322_vm6, 1, %v3335_v5  ;;  %vm1238_vm6 = vcmp.lt.s32.totalorder %v1237_v16, 16 }
  0xad   : > { %v1301_v6 = vsel %vm1300_vm5, 1, %v3335_v5  ;;  %v1325_v15 = vadd.s32 %v1323_v11, %v1317_v62  ;;  %vm1326_vm8 = vc.u32 %v1324_v8, %v1320_v0  ;;  %v1328_v23 = vadd.s32 %v1324_v8, %v1320_v0  ;;  %v1683_v7 = vld [vmem:[%s3979_s13] sm:$0xff] }
  0xae   : > { %v1303_v10 = vadd.s32 %v1301_v6, %v1295_v59  ;;  %vm1304_vm7 = vc.u32 %v1302_v2, %v1298_v61  ;;  %v1327_v19 = vsel %vm1326_vm8, 1, %v3335_v5  ;;  %v1192_v55 = vsel %vm1191_vm12, %v1190_v52, 0.0 }
  0xaf   : > { %v1305_v12 = vsel %vm1304_vm7, 1, %v3335_v5  ;;  %v1329_v21 = vadd.s32 %v1327_v19, %v1325_v15  ;;  %1193 = vadd.xlane.f32.xlu0 %v1192_v55  ;;  %vm1382_vm5 = vweird.f32 %v3667_v4  ;;  %vm1567_vm7 = vcmask 261120  }
  0xb0   : > { %v1307_v18 = vadd.s32 %v1305_v12, %v1303_v10 }
  0xb1   : > { %v1330_v25 = vadd.s32 %v1329_v21, %v1319_v13 }
  0xb2   : > { %v1308_v22 = vadd.s32 %v1307_v18, %v1297_v9 }
  0xb3   : > { %v1331_v27 = vadd.s32 %v1330_v25, %v1321_v20 }
  0xb4   : > { %v1309_v26 = vadd.s32 %v1308_v22, %v1299_v17 }
  0xb5   : > { %v1335_v29 = vadd.s32 1, %v1331_v27 }
  0xb6   : > { %vm1334_vm9 = vc.u32 %v1309_v26, %v1328_v23  ;;  %v1333_v40 = vadd.s32 %v1328_v23, %v1309_v26 }
  0xb7   : > { %v1336_v30 = vsel %vm1334_vm9, %v1335_v29, %v1331_v27 }
  0xb8   : > { %v1337_v31 = vadd.s32 %v1336_v30, %v1332_v28 }
  0xba   : > { %v1338_v33 = vadd.s32 536870912, %v1337_v31 }
  0xbc   : > { %v1339_v34 = vshrl.u32 %v1338_v33, 30  ;;  %v2937_v33 = vld [vmem:[%s3974_s8 + $0x38] sm:$0xff] }
  0xbd   : > { %1670 = vmatpush.bf16.msra.mxu2 %v2937_v33 }
  0xbe   : > { %v1340_v35 = vshll.u32 %v1339_v34, 30  ;;  %v1363_v54 = vsub.s32 4, %v1339_v34 }
  0xc0   : > { %v1341_v36 = vsub.s32 %v1337_v31, %v1340_v35  ;;  %v1364_v58 = vsel %vm1241_vm13, %v1363_v54, %v1339_v34 }
  0xc1   : > { %v1366_v61 = vsel %vm1240_vm14, 0, %v1364_v58 }
  0xc2   : > { %vm1342_vm10 = vcmp.lt.s32.totalorder %v1341_v36, 0  ;;  %v1343_v37 = vsub.s32 0, %v1341_v36  ;;  %v1537_v2 = vadd.s32 3, %v1366_v61  ;;  %v1383_v9 = vand.u32 3, %v1366_v61 }
  0xc4   : > { %v1344_v38 = vsel %vm1342_vm10, %v1343_v37, %v1341_v36  ;;  %v1538_v10 = vand.u32 3, %v1537_v2  ;;  %vm1388_vm15 = vcmp.eq.s32.totalorder %v1383_v9, 2  ;;  %vm1384_vm1 = vcmp.lt.s32.totalorder %v1383_v9, 2 }
  0xc5   : > { %v1345_v39 = vclz %v1344_v38  ;;  %vm1385_vm2 = vcmp.eq.s32.totalorder %v1383_v9, 0  ;;  %v1189_v38 = vmul.f32 2.0, %v3709_v51  ;;  %v1621_v9 = vld [vmem:[%s3978_s2] sm:$0x1] }
  0xc6   : > { %vm1543_vm0 = vcmp.eq.s32.totalorder %v1538_v10, 2  ;;  %vm1540_vm3 = vcmp.eq.s32.totalorder %v1538_v10, 0  ;;  %vm1539_vm4 = vcmp.lt.s32.totalorder %v1538_v10, 2 }
  0xc7   : > { %v2781_v14 = vadd.s32 4294967294, %v1345_v39 }
  0xc9   : > { %vm2782_vm11 = vcmp.lt.s32.totalorder %v2781_v14, 0 }
  0xca   : > { %v1348_v41 = vsel %vm2782_vm11, 0, %v2781_v14  ;;  %v2935_v14 = vld [vmem:[%s3974_s8 + $0x28] sm:$0xff]  ;;  %vm1215_vm11 = vcmask 1041408  }
  0xcb   : > { %v1349_v42 = vsub.s32 32, %v1348_v41  ;;  %v1350_v43 = vshll.u32 %v1341_v36, %v1348_v41  ;;  %v1353_v32 = vsub.s32 4294967266, %v1348_v41  ;;  %v2936_v36 = vld [vmem:[%s3974_s8 + $0x30] sm:$0xff] }
  0xcc   : > { %1671 = vmatpush.bf16.msra.mxu2 %v2936_v36 }
  0xcd   : > { %v1351_v44 = vshrl.u32 %v1333_v40, %v1349_v42  ;;  %v1354_v45 = vadd.s32 127, %v1353_v32  ;;  %v1207_v40 = vld [vmem:[%s3975_s30] sm:$0x3]  ;;  %s3981_s30 = sld [smem:[#allocation23_spill]] }
  0xce   : > { %v1217_v42 = vsel %vm1215_vm11, %v1207_v40, 0 }
  0xcf   : > { %v1352_v46 = vor.u32 %v1351_v44, %v1350_v43  ;;  %v1355_v47 = vshll.u32 %v1354_v45, 23  ;;  %v2934_v43 = vld [vmem:[%s3974_s8 + $0x20] sm:$0xff]  ;;  %1226 = vmatpush.bf16.msra.mxu0 %v1217_v42  ;;  %v2933_v45 = vld [vmem:[%s3974_s8 + $0x18] sm:$0xff] }
  0xd0   : > { %1672 = vmatpush.bf16.msra.mxu2 %v2935_v14  ;;  %v3098_v14 = vld [vmem:[%s3980_s10] ss:$0 sm:$0xff] }
  0xd1   : > { %v1356_v48 = vor.u32 4788187, %v1355_v47  ;;  %v1359_v49 = vcvt.s32.f32 %v1352_v46  ;;  %v2932_v46 = vld [vmem:[%s3974_s8 + $0x10] sm:$0xff]  ;;  %v2931_v47 = vld [vmem:[%s3974_s8 + $0x8] sm:$0xff] }
  0xd3   : > { %v1357_v50 = vand.u32 2147483647, %v1356_v48  ;;  %v2930_v48 = vld [vmem:[%s3974_s8] sm:$0xff] }
  0xd4   : > { %1673 = vmatpush.bf16.msra.mxu2 %v2934_v43 }
  0xd5   : > { %v1360_v53 = vmul.f32 %v1359_v49, %v1357_v50  ;;  %v1554_v49 = vld [vmem:[%s3976_s23] sm:$0x1] }
  0xd7   : > { %v1361_v56 = vxor.u32 2147483648, %v1360_v53 }
  0xd8   : > { %1674 = vmatpush.bf16.msra.mxu2 %v2933_v45 }
  0xd9   : > { %v1362_v57 = vsel %vm1241_vm13, %v1361_v56, %v1360_v53 }
  0xda   : > { %v1365_v59 = vsel %vm1240_vm14, %v3667_v4, %v1362_v57 }
  0xdb   : > { %v1367_v60 = vmul.f32 %v1365_v59, %v1365_v59 }
  0xdc   : > { %1675 = vmatpush.bf16.msra.mxu2 %v2932_v46 }
  0xdd   : > { %v1368_v62 = vmul.f32 -0.001358992, %v1367_v60  ;;  %v1375_v63 = vmul.f32 -0.00019511016, %v1367_v60 }
  0xdf   : > { %v1369_v0 = vadd.f32 0.041655596, %v1368_v62  ;;  %v1376_v1 = vadd.f32 0.008332121, %v1375_v63 }
  0xe0   : > { %1676 = vmatpush.bf16.msra.mxu2 %v2931_v47 }
  0xe1   : > { %v1370_v3 = vmul.f32 %v1369_v0, %v1367_v60  ;;  %v1377_v5 = vmul.f32 %v1376_v1, %v1367_v60 }
  0xe3   : > { %v1371_v6 = vadd.f32 -0.4999988, %v1370_v3  ;;  %v1378_v8 = vadd.f32 -0.16666654, %v1377_v5 }
  0xe4   : > { %1677 = vmatpush.bf16.msra.mxu2 %v2930_v48 }
  0xe5   : > { %v1372_v11 = vmul.f32 %v1371_v6, %v1367_v60  ;;  %v1379_v12 = vmul.f32 %v1378_v8, %v1367_v60  ;;  %v3097_v8 = vld [vmem:[%s3977_s0] ss:$0 sm:$0xff] }
  0xe7   : > { %v1373_v13 = vadd.f32 1.0, %v1372_v11  ;;  %v1380_v15 = vadd.f32 1.0, %v1379_v12 }
  0xe9   : > { %v1381_v17 = vmul.f32 %v1380_v15, %v1365_v59  ;;  %v1389_v18 = vxor.u32 2147483648, %v1373_v13 }
  0xeb   : > { %v1386_v19 = vxor.u32 2147483648, %v1381_v17  ;;  %v1390_v20 = vsel %vm1388_vm15, %v1389_v18, %v1381_v17  ;;  %v1545_v21 = vsel %vm1543_vm0, %v1389_v18, %v1381_v17 }
  0xed   : > { %v1387_v22 = vsel %vm1385_vm2, %v1373_v13, %v1386_v19  ;;  %v1542_v23 = vsel %vm1540_vm3, %v1373_v13, %v1386_v19  ;;  %v3336_v19 = vmov 32.0  }
  0xee   : > { %v1391_v24 = vsel %vm1384_vm1, %v1387_v22, %v1390_v20  ;;  %v1546_v25 = vsel %vm1539_vm4, %v1542_v23, %v1545_v21 }
  0xef   : > { %v1392_v26 = vsel %vm1382_vm5, nan, %v1391_v24  ;;  %v1547_v27 = vsel %vm1382_vm5, nan, %v1546_v25 }
  0xf0   : > { %v1548_v28 = vsel %vm1238_vm6, %v1392_v26, %v1547_v27 }
  0xf1   : > { %v1549_v29 = vpack.c.bf16 %v1548_v28, %v1548_v28 }
  0xf3   : > { %2794 = vmatmul.msk.bf16.vlgmr.msra.gmra.mxu1 %vm1567_vm7, %v1549_v29 }
 0x122   : > { %v1194_v30 = vpop.xlane.xlu0 %1193 }
 0x123   : > { %3100 = vrsqrt.f32 %v1194_v30  ;;  %vm1201_vm8 = vweird.f32 %v1194_v30 }
 0x129   : > { %v3101_v31 = vpop.eup %3100 }
 0x12a   : > { %v1196_v4 = vmul.f32 %v3101_v31, %v1194_v30  ;;  %vm1202_vm9 = vweird.f32 %v3101_v31 }
 0x12b   : > { %vm1203_vm10 = vmor %vm1201_vm8, %vm1202_vm9 }
 0x12c   : > { %v1197_v34 = vmul.f32 %v3101_v31, %v1196_v4 }
 0x12e   : > { %v1198_v35 = vmul.f32 0.5, %v1197_v34 }
 0x130   : > { %v1199_v37 = vsub.f32 1.5, %v1198_v35 }
 0x132   : > { %v1200_v39 = vmul.f32 %v3101_v31, %v1199_v37 }
 0x134   : > { %v1204_v41 = vsel %vm1203_vm10, %v3101_v31, %v1200_v39 }
 0x135   : > { %v1205_v32 = vmul.f32 %v1204_v41, %v1189_v38  ;;  %v3099_v41 = vld [vmem:[%s3981_s30] ss:$0 sm:$0xff] }
 0x137   : > { %v1206_v44 = vpack.c.bf16 %v1205_v32, %v1205_v32 }
 0x139   : > { %2779 = vmatmul.msk.bf16.vlgmr.msra.gmra.mxu0 %vm1191_vm12, %v1206_v44 }
 0x170   : > { %v1580_v50 = vpop.f32.mrf.mxu1 }
 0x171   : > { %v1581_v51 = vadd.f32 %v1580_v50, %v1554_v49 }
 0x173   : > { %v2795_v52 = vmul.f32 -1.442695, %v1581_v51 }
 0x175   : > { %3102 = vpow2.f32 %v2795_v52 }
 0x178   : > { %v1582_v53 = vpop.f32.mrf.mxu1 }
 0x17b   : > { %v3103_v54 = vpop.eup %3102 }
 0x17c   : > { %v1587_v55 = vadd.f32 1.0, %v3103_v54 }
 0x17e   : > { %3104 = vrcp.f32 %v1587_v55  ;;  %v1599_v59 = vand.u32 2147483648, %v1587_v55  ;;  %v1597_v61 = vand.u32 2147483647, %v1587_v55  ;;  %vm1593_vm13 = vweird.f32 %v1587_v55 }
 0x17f   : > { %3106 = vrcp.f32 %v3336_v19 }
 0x180   : > { %v1600_v63 = vor.u32 1.1754944e-38, %v1599_v59  ;;  %vm1598_vm15 = vcmp.eq.f32.partialorder %v1597_v61, 8.507059e+37 }
 0x184   : > { %v3105_v56 = vpop.eup %3104 }
 0x185   : > { %v1589_v57 = vmul.f32 %v3105_v56, %v1587_v55  ;;  %vm1594_vm12 = vweird.f32 %v3105_v56  ;;  %v3107_v20 = vpop.eup %3106 }
 0x186   : > { %vm1595_vm14 = vmor %vm1593_vm13, %vm1594_vm12  ;;  %v1693_v21 = vmul.f32 32.0, %v3107_v20  ;;  %vm1697_vm0 = vweird.f32 %v3107_v20 }
 0x187   : > { %v1590_v58 = vsub.f32 1.0, %v1589_v57 }
 0x188   : > { %v1694_v22 = vsub.f32 1.0, %v1693_v21 }
 0x189   : > { %v1591_v60 = vmul.f32 %v3105_v56, %v1590_v58 }
 0x18a   : > { %v1695_v23 = vmul.f32 %v3107_v20, %v1694_v22 }
 0x18b   : > { %v1592_v62 = vadd.f32 %v3105_v56, %v1591_v60 }
 0x18c   : > { %v1696_v24 = vadd.f32 %v3107_v20, %v1695_v23 }
 0x18d   : > { %v1596_v0 = vsel %vm1595_vm14, %v3105_v56, %v1592_v62 }
 0x18e   : > { %v1601_v1 = vsel %vm1598_vm15, %v1600_v63, %v1596_v0  ;;  %v1698_v25 = vsel %vm1697_vm0, %v3107_v20, %v1696_v24 }
 0x18f   : > { %v1603_v2 = vmul.f32 %v1601_v1, %v1581_v51 }
 0x191   : > { %v1604_v3 = vpack.c.bf16 %v1603_v2, %v1603_v2 }
 0x193   : > { %1678 = vmatmul.bf16.vlgmr.msra.gmra.mxu2 %v1604_v3 }
 0x1b6   : > { %v1228_v5 = vpop.f32.mrf.mxu0 }
 0x1b7   : > { %v1229_v10 = vadd.f32 %v3097_v8, %v1228_v5 }
 0x1b9   : > { %v1684_v13 = vadd.f32 %v1683_v7, %v1229_v10 }
 0x1be   : > { %v1230_v6 = vpop.f32.mrf.mxu0 }
 0x216   : > { %v1679_v11 = vpop.f32.mrf.mxu2 }
 0x217   : > { %v1680_v12 = vadd.f32 %v1679_v11, %v1621_v9 }
 0x219   : > { %v1685_v15 = vperm.slane %v1680_v12, 0 }
 0x21b   : > { %v1686_v16 = vadd.f32 %v1685_v15, %v1684_v13 }
 0x21d   : > { %v1689_v17 = vsel %vm1567_vm7, %v1686_v16, 0.0 }
 0x21e   : > { %v1681_v18 = vpop.f32.mrf.mxu2  ;;  %1690 = vadd.xlane.f32.xlu0 %v1689_v17 }
 0x291   : > { %v1691_v26 = vpop.xlane.xlu0 %1690 }
 0x292   : > { %v1699_v27 = vmul.f32 %v1698_v25, %v1691_v26 }
 0x294   : > { %v1700_v28 = vsub.f32 %v1686_v16, %v1699_v27 }
 0x296   : > { %v1701_v29 = vmul.f32 %v1700_v28, %v1700_v28 }
 0x298   : > { %v1702_v30 = vsel %vm1567_vm7, %v1701_v29, 0.0 }
 0x299   : > { %1703 = vadd.xlane.f32.xlu1 %v1702_v30 }
 0x30c   : > { %v1704_v31 = vpop.xlane.xlu1 %1703 }
 0x30d   : > { %v1705_v4 = vmul.f32 %v1704_v31, %v1698_v25 }
 0x30f   : > { %v1706_v33 = vadd.f32 1e-12, %v1705_v4 }
 0x311   : > { %3108 = vrsqrt.f32 %v1706_v33  ;;  %vm1713_vm2 = vweird.f32 %v1706_v33 }
 0x317   : > { %v3109_v34 = vpop.eup %3108 }
 0x318   : > { %v1708_v35 = vmul.f32 %v3109_v34, %v1706_v33  ;;  %vm1714_vm1 = vweird.f32 %v3109_v34 }
 0x319   : > { %vm1715_vm3 = vmor %vm1713_vm2, %vm1714_vm1 }
 0x31a   : > { %v1709_v36 = vmul.f32 %v3109_v34, %v1708_v35 }
 0x31c   : > { %v1710_v37 = vmul.f32 0.5, %v1709_v36 }
 0x31e   : > { %v1711_v38 = vsub.f32 1.5, %v1710_v37 }
 0x320   : > { %v1712_v39 = vmul.f32 %v3109_v34, %v1711_v38 }
 0x322   : > { %v1716_v40 = vsel %vm1715_vm3, %v3109_v34, %v1712_v39 }
 0x323   : > { %v1717_v42 = vmul.f32 %v1716_v40, %v1700_v28 }
 0x325   : > { %v1721_v43 = vmul.f32 %v3098_v14, %v1717_v42 }
 0x327   : > { %v1725_v32 = vadd.f32 %v3099_v41, %v1721_v43 }
 0x329   : > { %1726 = vst.msk [vmem:[#allocation2] sm:$0xff] %vm1567_vm7, %v1725_v32 }
 0x32a PF: > { %v2939_v44 = vld [vmem:[%s3630_s18 + $0x8] sm:$0xff]  ;;  %v2938_v45 = vld [vmem:[%s3630_s18] sm:$0xff]  ;;  %vm1749_vm4 = vcmask 261120   ;;  %s3982_s23 = scalar_lea.vmem %s3425_s6, %s3623_s16  ;;  %s3337_s0 = smov 120   ;;  %vm1769_vm5 = vcmask 64512  }
 0x32b   : > { %1759 = vmatpush.bf16.msra.mxu0 %v2939_v44  ;;  %v3110_v48 = vld [vmem:[%s3982_s23] ss:$0 sm:$0xff]  ;;  %s3338_s2 = smov 88   ;;  %s3339_s18 = smov 96  }
 0x32c   : > { %s3340_s13 = smov 64   ;;  %s3341_s10 = smov 80  }
 0x32d   : > { %s3342_s30 = smov 112   ;;  %s3343_s23 = smov 72  }
 0x32f   : > { %1760 = vmatpush.bf16.msra.mxu0 %v2938_v45 }
 0x330   : > { %v3742_v46 = vld [vmem:[#allocation2] sm:$0xff] }
 0x331   : > { %v1728_v47 = vpack.c.bf16 %v3742_v46, %v3742_v46 }
 0x333   : > { %2836 = vmatmul.msk.bf16.vlgmr.msra.gmra.mxu0 %vm1749_vm4, %v1728_v47 }
 0x3b0   : > { %v1762_v49 = vpop.f32.mrf.mxu0 }
 0x3b1   : > { %v3750_v50 = vadd.f32 %v3110_v48, %v1762_v49 }
 0x3b3   : > { %1845 = vrot.lane.b32.xlu2 %v3750_v50, %s3337_s0  ;;  %1847 = vrot.lane.b32.xlu1 %v3750_v50, %s3338_s2  ;;  %s3344_s0 = smov 56   ;;  %s3345_s2 = smov 104  }
 0x3b4   : > { %1767 = vrot.lane.b32.xlu0 %v3750_v50, %s3339_s18  ;;  %s3346_s18 = smov 40  }
 0x3b8   : > { %v1764_v51 = vpop.f32.mrf.mxu0 }
 0x3bb   : > { %1819 = vrot.lane.b32.xlu2 %v3750_v50, %s3340_s13  ;;  %s3347_s13 = smov 48  }
 0x3c3   : > { %1926 = vrot.lane.b32.xlu2 %v3750_v50, %s3341_s10  ;;  %s3348_s10 = smov 8  }
 0x3cb   : > { %1924 = vrot.lane.b32.xlu2 %v3750_v50, %s3342_s30  ;;  %s3349_s30 = smov 24  }
 0x3d3   : > { %2005 = vrot.lane.b32.xlu2 %v3750_v50, %s3343_s23  ;;  %s3350_s23 = smov 16  }
 0x40d   : > { %v1846_v52 = vpop.permute.xlu2 %1845 }
 0x415   : > { %v1820_v53 = vpop.permute.xlu2 %1819 }
 0x41d   : > { %v1927_v56 = vpop.permute.xlu2 %1926 }
 0x425   : > { %v1848_v54 = vpop.permute.xlu1 %1847  ;;  %v1925_v63 = vpop.permute.xlu2 %1924 }
 0x426   : > { %v1768_v55 = vpop.permute.xlu0 %1767  ;;  %2840 = vmatpush.xpose.msk.msra.mxu3 %vm1769_vm5, %v1848_v54 }
 0x427   : > { %2837 = vmatpush.xpose.msk.msra.mxu1 %vm1769_vm5, %v1768_v55 }
 0x429   : > { %2841 = vmatmul.msk.f32.vlgmr.msra.gmra.mxu3 %vm1769_vm5, %v1846_v52 }
 0x42a   : > { %2838 = vmatmul.msk.f32.vlgmr.msra.gmra.mxu1 %vm1769_vm5, %v3750_v50 }
 0x42b   : > { %1840 = vmatpush.msrb.mxu1 %v1820_v53 }
 0x42d   : > { %2843 = vmatpush.xpose.msk.msra.mxu1 %vm1769_vm5, %v1927_v56  ;;  %v2006_v0 = vpop.permute.xlu2 %2005 }
 0x4a7   : > { %v1791_v57 = vpop.f32.mrf.mxu1 }
 0x4a8   : > { %v1794_v58 = vmul.f32 0.35355338, %v1791_v57 }
 0x4aa   : > { %v1795_v59 = vsel %vm1769_vm5, %v1794_v58, -inf }
 0x4ab   : > { %1796 = vmax.xlane.f32.xlu0 %v1795_v59 }
 0x4ac   : > { %v1870_v60 = vpop.f32.mrf.mxu3 }
 0x4ad   : > { %v1873_v61 = vmul.f32 0.35355338, %v1870_v60 }
 0x4af   : > { %v1874_v62 = vsel %vm1769_vm5, %v1873_v61, -inf }
 0x4b0   : > { %1875 = vmax.xlane.f32.xlu2 %v1874_v62 }
 0x4c8   : > { %1898 = vrot.lane.b32.xlu2 %v3750_v50, %s3344_s0  ;;  %s3983_s0 = scalar_lea.vmem %s3435_s20, %s3623_s16 }
 0x51e   : > { %v1797_v1 = vpop.xlane.xlu0 %1796 }
 0x51f   : > { %v1798_v2 = vsub.f32 %v1794_v58, %v1797_v1 }
 0x521   : > { %v1799_v3 = vmul.f32 1.442695, %v1798_v2 }
 0x523   : > { %3118 = vpow2.f32 %v1799_v3  ;;  %v1876_v5 = vpop.xlane.xlu2 %1875 }
 0x524   : > { %v1877_v26 = vsub.f32 %v1873_v61, %v1876_v5 }
 0x526   : > { %v1878_v28 = vmul.f32 1.442695, %v1877_v26 }
 0x529   : > { %v3119_v6 = vpop.eup %3118 }
 0x52a   : > { %v1801_v8 = vsel %vm1769_vm5, %v3119_v6, 0.0 }
 0x52b   : > { %1802 = vadd.xlane.f32.xlu1 %v1801_v8  ;;  %v1899_v9 = vpop.permute.xlu2 %1898 }
 0x52c   : > { %1919 = vmatpush.msrb.mxu3 %v1899_v9 }
 0x544   : > { %2003 = vrot.lane.b32.xlu1 %v3750_v50, %s3345_s2 }
 0x59e   : > { %v1803_v10 = vpop.xlane.xlu1 %1802 }
 0x59f   : > { %3120 = vrcp.f32 %v1803_v10  ;;  %v1815_v13 = vand.u32 2147483648, %v1803_v10  ;;  %v1813_v16 = vand.u32 2147483647, %v1803_v10  ;;  %vm1809_vm7 = vweird.f32 %v1803_v10 }
 0x5a0   : > { %3122 = vpow2.f32 %v1878_v28 }
 0x5a1   : > { %v1816_v18 = vor.u32 1.1754944e-38, %v1815_v13  ;;  %vm1814_vm9 = vcmp.eq.f32.partialorder %v1813_v16, 8.507059e+37 }
 0x5a5   : > { %v3121_v7 = vpop.eup %3120 }
 0x5a6   : > { %v1805_v11 = vmul.f32 %v3121_v7, %v1803_v10  ;;  %vm1810_vm6 = vweird.f32 %v3121_v7  ;;  %v3123_v4 = vpop.eup %3122 }
 0x5a7   : > { %vm1811_vm8 = vmor %vm1809_vm7, %vm1810_vm6  ;;  %v1880_v33 = vsel %vm1769_vm5, %v3123_v4, 0.0 }
 0x5a8   : > { %v1806_v12 = vsub.f32 1.0, %v1805_v11 }
 0x5aa   : > { %v1807_v15 = vmul.f32 %v3121_v7, %v1806_v12 }
 0x5ac   : > { %v1808_v17 = vadd.f32 %v3121_v7, %v1807_v15 }
 0x5ae   : > { %v1812_v19 = vsel %vm1811_vm8, %v3121_v7, %v1808_v17  ;;  %vm2095_vm8 = vcmask 130048  }
 0x5af   : > { %v1817_v20 = vsel %vm1814_vm9, %v1816_v18, %v1812_v19  ;;  %vm2097_vm9 = vcmask 195584  }
 0x5b0   : > { %v1818_v21 = vmul.f32 %v3119_v6, %v1817_v20 }
 0x5b2   : > { %2839 = vmatmul.msk.f32.vlgmr.msrb.gmra.mxu1 %vm1769_vm5, %v1818_v21 }
 0x5b3   : > { %2846 = vmatpush.xpose.msk.msrb.mxu1 %vm1769_vm5, %v2006_v0 }
 0x5b6   : > { %v2004_v22 = vpop.permute.xlu1 %2003 }
 0x5ba   : > { %2844 = vmatmul.msk.f32.vlgmr.msra.gmra.mxu1 %vm1769_vm5, %v1925_v63 }
 0x5c2   : > { %2847 = vmatmul.msk.f32.vlgmr.msrb.gmra.mxu1 %vm1769_vm5, %v2004_v22  ;;  %v2941_v22 = vld [vmem:[%s3635_s7 + $0x8] sm:$0xff] }
 0x62f   : > { %v3774_v23 = vpop.f32.mrf.mxu1 }
 0x637   : > { %v1949_v24 = vpop.f32.mrf.mxu1 }
 0x638   : > { %v1952_v25 = vmul.f32 0.35355338, %v1949_v24  ;;  %v2940_v24 = vld [vmem:[%s3635_s7] sm:$0xff] }
 0x63a   : > { %v1953_v27 = vsel %vm1769_vm5, %v1952_v25, -inf }
 0x63b   : > { %1954 = vmax.xlane.f32.xlu1 %v1953_v27 }
 0x63f   : > { %v2028_v29 = vpop.f32.mrf.mxu1 }
 0x640   : > { %v2031_v30 = vmul.f32 0.35355338, %v2028_v29 }
 0x642   : > { %v2032_v31 = vsel %vm1769_vm5, %v2031_v30, -inf }
 0x643   : > { %2033 = vmax.xlane.f32.xlu0 %v2032_v31 }
 0x64b   : > { %1881 = vadd.xlane.f32.xlu0 %v1880_v33 }
 0x654   : > { %2056 = vrot.lane.b32.xlu1 %v3750_v50, %s3346_s18 }
 0x6ae   : > { %v1955_v34 = vpop.xlane.xlu1 %1954 }
 0x6af   : > { %v1956_v35 = vsub.f32 %v1952_v25, %v1955_v34 }
 0x6b1   : > { %v1957_v36 = vmul.f32 1.442695, %v1956_v35 }
 0x6b3   : > { %3124 = vpow2.f32 %v1957_v36 }
 0x6b6   : > { %v2034_v37 = vpop.xlane.xlu0 %2033 }
 0x6b7   : > { %v2035_v38 = vsub.f32 %v2031_v30, %v2034_v37 }
 0x6b9   : > { %v3780_v39 = vpop.eup %3124  ;;  %v2036_v14 = vmul.f32 1.442695, %v2035_v38  ;;  %v3351_v38 = vmov 32.0  }
 0x6ba   : > { %v1959_v40 = vsel %vm1769_vm5, %v3780_v39, 0.0 }
 0x6bb   : > { %3126 = vpow2.f32 %v2036_v14  ;;  %1960 = vadd.xlane.f32.xlu0 %v1959_v40 }
 0x6be   : > { %v1882_v41 = vpop.xlane.xlu0 %1881 }
 0x6bf   : > { %3128 = vrcp.f32 %v1882_v41  ;;  %v1894_v48 = vand.u32 2147483648, %v1882_v41  ;;  %v1892_v51 = vand.u32 2147483647, %v1882_v41  ;;  %vm1888_vm11 = vweird.f32 %v1882_v41 }
 0x6c1   : > { %v3127_v42 = vpop.eup %3126  ;;  %v1895_v53 = vor.u32 1.1754944e-38, %v1894_v48  ;;  %vm1893_vm13 = vcmp.eq.f32.partialorder %v1892_v51, 8.507059e+37  ;;  %v2942_v48 = vld [vmem:[%s3644_s29] sm:$0xff] }
 0x6c2   : > { %v2038_v43 = vsel %vm1769_vm5, %v3127_v42, 0.0 }
 0x6c3   : > { %2039 = vadd.xlane.f32.xlu0 %v2038_v43 }
 0x6c5   : > { %v3129_v32 = vpop.eup %3128 }
 0x6c6   : > { %v1884_v44 = vmul.f32 %v3129_v32, %v1882_v41  ;;  %v2057_v45 = vpop.permute.xlu1 %2056  ;;  %vm1889_vm10 = vweird.f32 %v3129_v32 }
 0x6c7   : > { %2077 = vmatpush.msra.mxu1 %v2057_v45  ;;  %vm1890_vm12 = vmor %vm1888_vm11, %vm1889_vm10 }
 0x6c8   : > { %v1885_v47 = vsub.f32 1.0, %v1884_v44 }
 0x6ca   : > { %v1886_v49 = vmul.f32 %v3129_v32, %v1885_v47  ;;  %v2943_v47 = vld [vmem:[%s3644_s29 + $0x8] sm:$0xff]  ;;  %s3984_s29 = scalar_lea.vmem %s3445_s4, %s3623_s16 }
 0x6cb   : > { %2206 = vmatpush.bf16.msrb.mxu0 %v2943_v47 }
 0x6cc   : > { %v1887_v52 = vadd.f32 %v3129_v32, %v1886_v49  ;;  %v2951_v49 = vld [vmem:[%s3652_s1 + $0x38] sm:$0xff] }
 0x6cd   : > { %2291 = vmatpush.bf16.msra.mxu2 %v2951_v49 }
 0x6ce   : > { %v1891_v54 = vsel %vm1890_vm12, %v3129_v32, %v1887_v52 }
 0x6cf   : > { %v1896_v55 = vsel %vm1893_vm13, %v1895_v53, %v1891_v54  ;;  %2207 = vmatpush.bf16.msrb.mxu0 %v2942_v48 }
 0x6d0   : > { %v1897_v56 = vmul.f32 %v3123_v4, %v1896_v55  ;;  %v3111_v4 = vld [vmem:[%s3983_s0] ss:$0 sm:$0xff] }
 0x6d2   : > { %2842 = vmatmul.msk.f32.vlgmr.msrb.gmra.mxu3 %vm1769_vm5, %v1897_v56 }
 0x6d7   : > { %1977 = vrot.lane.b32.xlu0 %v3750_v50, %s3347_s13 }
 0x72e   : > { %v1961_v57 = vpop.xlane.xlu0 %1960 }
 0x72f   : > { %3130 = vrcp.f32 %v1961_v57  ;;  %v1973_v2 = vand.u32 2147483648, %v1961_v57  ;;  %vm1967_vm15 = vweird.f32 %v1961_v57  ;;  %v1971_v5 = vand.u32 2147483647, %v1961_v57 }
 0x731   : > { %v1974_v10 = vor.u32 1.1754944e-38, %v1973_v2  ;;  %vm1972_vm3 = vcmp.eq.f32.partialorder %v1971_v5, 8.507059e+37  ;;  %v2949_v5 = vld [vmem:[%s3652_s1 + $0x28] sm:$0xff] }
 0x735   : > { %v3131_v58 = vpop.eup %3130 }
 0x736   : > { %v1963_v59 = vmul.f32 %v3131_v58, %v1961_v57  ;;  %v2040_v60 = vpop.xlane.xlu0 %2039  ;;  %vm1968_vm14 = vweird.f32 %v3131_v58 }
 0x737   : > { %3132 = vrcp.f32 %v2040_v60  ;;  %v2052_v6 = vand.u32 2147483648, %v2040_v60  ;;  %vm1969_vm0 = vmor %vm1967_vm15, %vm1968_vm14  ;;  %v2050_v50 = vand.u32 2147483647, %v2040_v60  ;;  %vm2046_vm2 = vweird.f32 %v2040_v60 }
 0x738   : > { %v1964_v61 = vsub.f32 1.0, %v1963_v59  ;;  %3134 = vrcp.f32 %v3351_v38 }
 0x739   : > { %v2053_v11 = vor.u32 1.1754944e-38, %v2052_v6  ;;  %vm2051_vm7 = vcmp.eq.f32.partialorder %v2050_v50, 8.507059e+37  ;;  %v2948_v6 = vld [vmem:[%s3652_s1 + $0x20] sm:$0xff]  ;;  %v2946_v50 = vld [vmem:[%s3652_s1 + $0x10] sm:$0xff] }
 0x73a   : > { %v1965_v62 = vmul.f32 %v3131_v58, %v1964_v61 }
 0x73c   : > { %v1966_v1 = vadd.f32 %v3131_v58, %v1965_v62 }
 0x73d   : > { %v3133_v63 = vpop.eup %3132 }
 0x73e   : > { %v2042_v0 = vmul.f32 %v3133_v63, %v2040_v60  ;;  %vm2047_vm1 = vweird.f32 %v3133_v63  ;;  %v1970_v9 = vsel %vm1969_vm0, %v3131_v58, %v1966_v1  ;;  %v3112_v60 = vld [vmem:[%s1157_s26] ss:$0 sm:$0xff] }
 0x73f   : > { %vm2048_vm6 = vmor %vm2046_vm2, %vm2047_vm1  ;;  %v1975_v12 = vsel %vm1972_vm3, %v1974_v10, %v1970_v9  ;;  %v2945_v9 = vld [vmem:[%s3652_s1 + $0x8] sm:$0xff]  ;;  %v2944_v10 = vld [vmem:[%s3652_s1] sm:$0xff] }
 0x740   : > { %v2043_v3 = vsub.f32 1.0, %v2042_v0  ;;  %v1976_v18 = vmul.f32 %v3780_v39, %v1975_v12 }
 0x742   : > { %v2044_v8 = vmul.f32 %v3133_v63, %v2043_v3  ;;  %v2950_v3 = vld [vmem:[%s3652_s1 + $0x30] sm:$0xff] }
 0x743   : > { %2292 = vmatpush.bf16.msra.mxu2 %v2950_v3 }
 0x744   : > { %v2045_v7 = vadd.f32 %v3133_v63, %v2044_v8  ;;  %v2947_v8 = vld [vmem:[%s3652_s1 + $0x18] sm:$0xff] }
 0x746   : > { %v2049_v13 = vsel %vm2048_vm6, %v3133_v63, %v2045_v7  ;;  %v3113_v63 = vld [vmem:[%s3984_s29] ss:$0 sm:$0xff] }
 0x747   : > { %v2054_v15 = vsel %vm2051_vm7, %v2053_v11, %v2049_v13  ;;  %2293 = vmatpush.bf16.msra.mxu2 %v2949_v5  ;;  %v3114_v7 = vld [vmem:[%s1168_s22] ss:$0 sm:$0xff] }
 0x748   : > { %v2055_v16 = vmul.f32 %v3127_v42, %v2054_v15 }
 0x749   : > { %v1978_v17 = vpop.permute.xlu0 %1977 }
 0x74a   : > { %1998 = vmatpush.msra.mxu3 %v1978_v17  ;;  %2848 = vmatmul.msk.f32.vlgmr.msra.gmra.mxu1 %vm1769_vm5, %v2055_v16 }
 0x74b   : > { %2845 = vmatmul.msk.f32.vlgmr.msra.gmra.mxu3 %vm1769_vm5, %v1976_v18  ;;  %2294 = vmatpush.bf16.msra.mxu2 %v2948_v6 }
 0x74c   : > { %2129 = vmatpush.bf16.msrb.mxu3 %v2941_v22 }
 0x74f   : > { %2295 = vmatpush.bf16.msra.mxu2 %v2947_v8 }
 0x750   : > { %2130 = vmatpush.bf16.msrb.mxu3 %v2940_v24 }
 0x753   : > { %2296 = vmatpush.bf16.msra.mxu2 %v2946_v50 }
 0x755   : > { %v1921_v19 = vpop.f32.mrf.mxu3 }
 0x756   : > { %2083 = vrot.lane.b32.xlu0 %v1921_v19, %s3348_s10 }
 0x757   : > { %2297 = vmatpush.bf16.msra.mxu2 %v2945_v9 }
 0x75b   : > { %2298 = vmatpush.bf16.msra.mxu2 %v2944_v10 }
 0x7c7   : > { %v2079_v20 = vpop.f32.mrf.mxu1 }
 0x7c8   : > { %2091 = vrot.lane.b32.xlu1 %v2079_v20, %s3349_s30  ;;  %v2084_v25 = vpop.permute.xlu0 %2083 }
 0x7c9   : > { %v2094_v27 = vsel %vm1769_vm5, %v3774_v23, %v2084_v25  ;;  %v3135_v23 = vpop.eup %3134 }
 0x7ca   : > { %v2143_v39 = vmul.f32 32.0, %v3135_v23  ;;  %vm2147_vm5 = vweird.f32 %v3135_v23 }
 0x7cc   : > { %v2144_v14 = vsub.f32 1.0, %v2143_v39 }
 0x7ce   : > { %v2000_v21 = vpop.f32.mrf.mxu3  ;;  %v2145_v40 = vmul.f32 %v3135_v23, %v2144_v14 }
 0x7cf   : > { %2087 = vrot.lane.b32.xlu2 %v2000_v21, %s3350_s23 }
 0x7d0   : > { %v2146_v41 = vadd.f32 %v3135_v23, %v2145_v40 }
 0x7d2   : > { %v3800_v42 = vsel %vm2147_vm5, %v3135_v23, %v2146_v41 }
 0x829   : > { %v2088_v26 = vpop.permute.xlu2 %2087 }
 0x82a   : > { %v2096_v28 = vsel %vm2095_vm8, %v2094_v27, %v2088_v26  ;;  %v3115_v26 = vld [vmem:[%s1176_s21] ss:$0 sm:$0xff]  ;;  %s3985_s21 = sld [smem:[#allocation36_spill]] }
 0x830   : > { %p2899_p0 = scmp.ne.s32.totalorder %s3985_s21, 1 }
 0x831   : > { %s3986_s26 = sld [smem:[#allocation25_spill]] (!%p2899_p0) }
 0x832   : > { %s3988_s1 = sld [smem:[#allocation26_spill]] (!%p2899_p0) }
 0x833   : > { %s3991_s7 = sld [smem:[#allocation27_spill]] (!%p2899_p0) }
 0x834   : > { %s3992_s22 = sld [smem:[#allocation28_spill]] (!%p2899_p0) }
 0x837   : > { %s3987_s18 = smov (!%p2899_p0), %s3986_s26 }
 0x83a   : > { %v2092_v29 = vpop.permute.xlu1 %2091 }
 0x83b   : > { %v2098_v30 = vsel %vm2097_vm9, %v2096_v28, %v2092_v29 }
 0x83c   : > { %v2099_v31 = vpack.c.bf16 %v2098_v30, %v2098_v30 }
 0x83e   : > { %2857 = vmatmul.msk.bf16.vlgmr.msrb.gmra.mxu3 %vm1749_vm4, %v2099_v31 }
 0x8c1   : > { %v2132_v33 = vpop.f32.mrf.mxu3 }
 0x8c2   : > { %v2133_v34 = vadd.f32 %v3111_v4, %v2132_v33 }
 0x8c4   : > { %v2136_v35 = vadd.f32 %v2133_v34, %v3742_v46 }
 0x8c6   : > { %v2139_v36 = vsel %vm1749_vm4, %v2136_v35, 0.0 }
 0x8c7   : > { %2140 = vadd.xlane.f32.xlu0 %v2139_v36 }
 0x8c9   : > { %v2134_v37 = vpop.f32.mrf.mxu3 }
 0x93a   : > { %v2141_v43 = vpop.xlane.xlu0 %2140 }
 0x93b   : > { %v2149_v46 = vmul.f32 %v3800_v42, %v2141_v43 }
 0x93d   : > { %v2150_v32 = vsub.f32 %v2136_v35, %v2149_v46 }
 0x93f   : > { %v2151_v44 = vmul.f32 %v2150_v32, %v2150_v32 }
 0x941   : > { %v2152_v45 = vsel %vm1749_vm4, %v2151_v44, 0.0 }
 0x942   : > { %2153 = vadd.xlane.f32.xlu2 %v2152_v45  ;;  %v3117_v45 = vld [vmem:[%s1182_s15] ss:$0 sm:$0xff]  ;;  %s3993_s15 = sld [smem:[#allocation30_spill]] (!%p2899_p0) }
 0x9b5   : > { %v2154_v51 = vpop.xlane.xlu2 %2153 }
 0x9b6   : > { %v2155_v52 = vmul.f32 %v2154_v51, %v3800_v42 }
 0x9b8   : > { %v2156_v53 = vadd.f32 1e-12, %v2155_v52 }
 0x9ba   : > { %3136 = vrsqrt.f32 %v2156_v53  ;;  %vm2163_vm11 = vweird.f32 %v2156_v53 }
 0x9c0   : > { %v3137_v54 = vpop.eup %3136 }
 0x9c1   : > { %v2158_v55 = vmul.f32 %v3137_v54, %v2156_v53  ;;  %vm2164_vm10 = vweird.f32 %v3137_v54 }
 0x9c2   : > { %vm2165_vm12 = vmor %vm2163_vm11, %vm2164_vm10 }
 0x9c3   : > { %v2159_v56 = vmul.f32 %v3137_v54, %v2158_v55 }
 0x9c5   : > { %v2160_v57 = vmul.f32 0.5, %v2159_v56 }
 0x9c7   : > { %v2161_v58 = vsub.f32 1.5, %v2160_v57 }
 0x9c9   : > { %v2162_v59 = vmul.f32 %v3137_v54, %v2161_v58 }
 0x9cb   : > { %v2166_v61 = vsel %vm2165_vm12, %v3137_v54, %v2162_v59 }
 0x9cc   : > { %v2167_v62 = vmul.f32 %v2166_v61, %v2150_v32  ;;  %v3116_v32 = vld [vmem:[%s1179_s28] ss:$0 sm:$0xff]  ;;  %s3989_s28 = sld [smem:[#allocation29_spill]] (!%p2899_p0) }
 0x9ce   : > { %v2171_v0 = vmul.f32 %v3112_v60, %v2167_v62 }
 0x9d0   : > { %v2175_v1 = vadd.f32 %v3113_v63, %v2171_v0 }
 0x9d2   : > { %v2176_v2 = vpack.c.bf16 %v2175_v1, %v2175_v1  ;;  %s3990_s16 = smov (!%p2899_p0), %s3989_s28 }
 0x9d4   : > { %2866 = vmatmul.msk.bf16.vlgmr.msrb.gmra.mxu0 %vm1749_vm4, %v2176_v2 }
 0xa51   : > { %v2209_v11 = vpop.f32.mrf.mxu0 }
 0xa52   : > { %v2210_v12 = vadd.f32 %v3114_v7, %v2209_v11 }
 0xa54   : > { %v2213_v13 = vmul.f32 %v2210_v12, %v2210_v12 }
 0xa56   : > { %v2214_v15 = vmul.f32 %v2213_v13, %v2210_v12 }
 0xa58   : > { %v2215_v16 = vmul.f32 0.044715, %v2214_v15 }
 0xa59   : > { %v2211_v17 = vpop.f32.mrf.mxu0 }
 0xa5a   : > { %v2216_v18 = vadd.f32 %v2215_v16, %v2210_v12 }
 0xa5c   : > { %v2217_v19 = vmul.f32 0.7978846, %v2216_v18 }
 0xa5e   : > { %3138 = vtanh.f32 %v2217_v19 }
 0xa64   : > { %v3139_v20 = vpop.eup %3138 }
 0xa65   : > { %v2219_v21 = vadd.f32 1.0, %v3139_v20 }
 0xa67   : > { %v2220_v22 = vmul.f32 0.5, %v2219_v21 }
 0xa69   : > { %v2221_v24 = vmul.f32 %v2220_v22, %v2210_v12 }
 0xa6b   : > { %v2222_v25 = vpack.c.bf16 %v2221_v24, %v2221_v24 }
 0xa6d   : > { %2299 = vmatmul.bf16.vlgmr.msra.gmra.mxu2 %v2222_v25 }
 0xaf0   : > { %v2300_v27 = vpop.f32.mrf.mxu2 }
 0xaf1   : > { %v2301_v28 = vadd.f32 %v3115_v26, %v2300_v27 }
 0xaf3   : > { %v2304_v29 = vadd.f32 %v2301_v28, %v2175_v1 }
 0xaf5   : > { %v2307_v30 = vsel %vm1749_vm4, %v2304_v29, 0.0 }
 0xaf6   : > { %2308 = vadd.xlane.f32.xlu1 %v2307_v30 }
 0xaf8   : > { %v2302_v31 = vpop.f32.mrf.mxu2 }
 0xb69   : > { %v2309_v4 = vpop.xlane.xlu1 %2308 }
 0xb6a   : > { %v2310_v33 = vmul.f32 %v2309_v4, %v3800_v42 }
 0xb6c   : > { %v2311_v34 = vsub.f32 %v2304_v29, %v2310_v33 }
 0xb6e   : > { %v2312_v35 = vmul.f32 %v2311_v34, %v2311_v34 }
 0xb70   : > { %v2313_v36 = vsel %vm1749_vm4, %v2312_v35, 0.0 }
 0xb71   : > { %2314 = vadd.xlane.f32.xlu0 %v2313_v36 }
 0xbe4   : > { %v2315_v37 = vpop.xlane.xlu0 %2314 }
 0xbe5   : > { %v2316_v38 = vmul.f32 %v2315_v37, %v3800_v42 }
 0xbe7   : > { %v2317_v23 = vadd.f32 1e-12, %v2316_v38 }
 0xbe9   : > { %3140 = vrsqrt.f32 %v2317_v23  ;;  %vm2324_vm14 = vweird.f32 %v2317_v23 }
 0xbef   : > { %v3141_v39 = vpop.eup %3140 }
 0xbf0   : > { %v2319_v14 = vmul.f32 %v3141_v39, %v2317_v23  ;;  %vm2325_vm13 = vweird.f32 %v3141_v39 }
 0xbf1   : > { %vm2326_vm15 = vmor %vm2324_vm14, %vm2325_vm13 }
 0xbf2   : > { %v2320_v40 = vmul.f32 %v3141_v39, %v2319_v14 }
 0xbf4   : > { %v2321_v41 = vmul.f32 0.5, %v2320_v40 }
 0xbf6   : > { %v2322_v43 = vsub.f32 1.5, %v2321_v41 }
 0xbf8   : > { %v2323_v46 = vmul.f32 %v3141_v39, %v2322_v43 }
 0xbfa   : > { %v2327_v44 = vsel %vm2326_vm15, %v3141_v39, %v2323_v46 }
 0xbfb   : > { %v2328_v47 = vmul.f32 %v2327_v44, %v2311_v34 }
 0xbfd   : > { %v2332_v48 = vmul.f32 %v3116_v32, %v2328_v47  ;;  %2341 = sbr.rel (%p2899_p0) target bundleno = 3637 (0xe35), region = 152 }
 0xbff   : > { %v2336_v49 = vadd.f32 %v3117_v45, %v2332_v48 }
 0xc01   : > { %2337 = vst.msk [vmem:[#allocation2] sm:$0xff] %vm1749_vm4, %v2336_v49 }
 0xc02   : > { %2342 = vst.msk [vmem:[%s3660_s9] sm:$0xff] %vm1749_vm4, %v2336_v49  ;;  %v2953_v51 = vld [vmem:[%s3986_s26 + $0x8] sm:$0xff]  ;;  %v2952_v52 = vld [vmem:[%s3987_s18] sm:$0xff]  ;;  %v2343_v53 = vpack.c.bf16 %v2336_v49, %v2336_v49 }
 0xc03   : > { %2373 = vmatpush.bf16.msra.mxu0 %v2953_v51  ;;  %v3142_v54 = vld [vmem:[%s3988_s1] ss:$0 sm:$0xff]  ;;  %v2955_v10 = vld [vmem:[%s3989_s28 + $0x8] sm:$0xff] }
 0xc04   : > { %2451 = vmatpush.bf16.msra.mxu1 %v2955_v10  ;;  %v2954_v7 = vld [vmem:[%s3990_s16] sm:$0xff] }
 0xc05   : > { %v3143_v21 = vld [vmem:[%s3991_s7] ss:$0 sm:$0xff] }
 0xc06   : > { %v3144_v25 = vld [vmem:[%s3992_s22] ss:$0 sm:$0xff] }
 0xc07   : > { %2374 = vmatpush.bf16.msra.mxu0 %v2952_v52  ;;  %v3145_v28 = vld [vmem:[%s3993_s15] ss:$0 sm:$0xff] }
 0xc08   : > { %2452 = vmatpush.bf16.msra.mxu1 %v2954_v7 }
 0xc0a   : > { %2908 = vmatmul.msk.bf16.vlgmr.msra.gmra.mxu0 %vm1749_vm4, %v2343_v53 }
 0xc87   : > { %v2376_v55 = vpop.f32.mrf.mxu0 }
 0xc88   : > { %v2377_v56 = vadd.f32 %v3142_v54, %v2376_v55 }
 0xc8a   : > { %v2380_v57 = vmul.f32 %v2377_v56, %v2377_v56 }
 0xc8c   : > { %v2381_v58 = vmul.f32 %v2380_v57, %v2377_v56 }
 0xc8e   : > { %v2382_v59 = vmul.f32 0.044715, %v2381_v58 }
 0xc8f   : > { %v2378_v60 = vpop.f32.mrf.mxu0 }
 0xc90   : > { %v2383_v61 = vadd.f32 %v2382_v59, %v2377_v56 }
 0xc92   : > { %v2384_v62 = vmul.f32 0.7978846, %v2383_v61 }
 0xc94   : > { %3146 = vtanh.f32 %v2384_v62 }
 0xc9a   : > { %v3147_v63 = vpop.eup %3146 }
 0xc9b   : > { %v2386_v0 = vadd.f32 1.0, %v3147_v63 }
 0xc9d   : > { %v2387_v1 = vmul.f32 0.5, %v2386_v0 }
 0xc9f   : > { %v2388_v2 = vmul.f32 %v2387_v1, %v2377_v56 }
 0xca1   : > { %v2391_v3 = vsel %vm1749_vm4, %v2388_v2, 0.0 }
 0xca2   : > { %2392 = vadd.xlane.f32.xlu0 %v2391_v3 }
 0xd15   : > { %v2393_v5 = vpop.xlane.xlu0 %2392 }
 0xd16   : > { %v2394_v6 = vmul.f32 %v2393_v5, %v3800_v42 }
 0xd18   : > { %v2395_v8 = vsub.f32 %v2388_v2, %v2394_v6 }
 0xd1a   : > { %v2396_v50 = vmul.f32 %v2395_v8, %v2395_v8 }
 0xd1c   : > { %v2397_v9 = vsel %vm1749_vm4, %v2396_v50, 0.0 }
 0xd1d   : > { %2398 = vadd.xlane.f32.xlu0 %v2397_v9 }
 0xd90   : > { %v2399_v11 = vpop.xlane.xlu0 %2398 }
 0xd91   : > { %v2400_v12 = vmul.f32 %v2399_v11, %v3800_v42 }
 0xd93   : > { %v2401_v13 = vadd.f32 1e-12, %v2400_v12 }
 0xd95   : > { %3148 = vrsqrt.f32 %v2401_v13  ;;  %vm2408_vm1 = vweird.f32 %v2401_v13 }
 0xd9b   : > { %v3149_v15 = vpop.eup %3148 }
 0xd9c   : > { %v2403_v16 = vmul.f32 %v3149_v15, %v2401_v13  ;;  %vm2409_vm0 = vweird.f32 %v3149_v15 }
 0xd9d   : > { %vm2410_vm2 = vmor %vm2408_vm1, %vm2409_vm0 }
 0xd9e   : > { %v2404_v17 = vmul.f32 %v3149_v15, %v2403_v16 }
 0xda0   : > { %v2405_v18 = vmul.f32 0.5, %v2404_v17 }
 0xda2   : > { %v2406_v19 = vsub.f32 1.5, %v2405_v18 }
 0xda4   : > { %v2407_v20 = vmul.f32 %v3149_v15, %v2406_v19 }
 0xda6   : > { %v2411_v22 = vsel %vm2410_vm2, %v3149_v15, %v2407_v20 }
 0xda7   : > { %v2412_v24 = vmul.f32 %v2411_v22, %v2395_v8 }
 0xda9   : > { %v2416_v26 = vmul.f32 %v3143_v21, %v2412_v24 }
 0xdab   : > { %v2420_v27 = vadd.f32 %v3144_v25, %v2416_v26 }
 0xdad   : > { %v2421_v42 = vpack.c.bf16 %v2420_v27, %v2420_v27 }
 0xdaf   : > { %2917 = vmatmul.msk.bf16.vlgmr.msra.gmra.mxu1 %vm1749_vm4, %v2421_v42 }
 0xe2c   : > { %v2454_v29 = vpop.f32.mrf.mxu1 }
 0xe2d   : > { %v2455_v30 = vadd.f32 %v3145_v28, %v2454_v29 }
 0xe2f   : > { %2458 = vst [vmem:[%s3658_s11] sm:$0xff] %v2455_v30 }
 0xe34   : > { %v2456_v31 = vpop.f32.mrf.mxu1 }
 0xe35 PF: > { %s3994_s2 = sld [smem:[#allocation37_spill]]  ;;  %s2477_s29 = sshll.u32 %s3658_s11, 4  ;;  %s2478_s29 = int_to_ptr.vmem [resolvable:$true] %s2477_s29 }
 0xe36   : > { %s3995_s13 = sld [smem:[#allocation31_spill]] }
 0xe37   : > { %s3996_s10 = sld [smem:[#allocation46_spill]] }
 0xe3b   : > { %s2920_s23 = sshll.u32 %s3994_s2, 3 }
 0xe3c   : > { %s2475_s0 = scalar_lea.hbm %s3995_s13, %s2920_s23  ;;  %s3185_s7 = scalar_lea.hbm %s3995_s13, 16 }
 0xe3d   : > { %s2479_s21 = sshll.u32 %s2475_s0, 4  ;;  %s2460_s26 = scalar_lea.sflag [#allocation4], %s3996_s10  ;;  %s2480_s21 = int_to_ptr.hbm [resolvable:$true] %s2479_s21 }
 0xe3e   : > { %s3179_s1 = sshra.s32 %s2480_s21, 4  ;;  %s3180_s1 = int_to_ptr.hbm [resolvable:$true] %s3179_s1 }
 0xe3f   : > { %s3181_s28 = scalar_lea.hbm %s3180_s1, 8  ;;  %p3186_p5 = scmp.lt.s32.totalorder %s3180_s1, %s3995_s13 }
 0xe40   : > { %p3182_p1 = scmp.ne.s32.totalorder %s3180_s1, %s3181_s28  ;;  %p3187_p6 = scmp.lt.s32.totalorder %s3185_s7, %s3181_s28 }
 0xe42   : > { %p3183_p2 = pnand %p3182_p1, %p3567_p3  ;;  %p3188_p7 = por %p3187_p6, %p3186_p5 }
 0xe44   : > { %p3184_p4 = pneg %p3183_p2 }
 0xe46   : > { %p3189_p8 = pnand %p3188_p7, %p3184_p4 }
 0xe48   : > { %3192 = shalt.err (!%p3189_p8)
}
 0xe49   : > { %s3998_s11 = sld [smem:[#allocation32_spill]]  ;;  %s2491_s15 = sshll.u32 %s3660_s9, 4  ;;  %s2492_s15 = int_to_ptr.vmem [resolvable:$true] %s2491_s15 }
 0xe4a   : > { %2960 = dma.vmem_to_hbm [thread:$0]  (%p3567_p3), %s2478_s29, 128, %s2480_s21, %s2460_s26  }
 0xe4b   : > { %s2465_s0 = scalar_lea.sflag [#allocation8], %s3996_s10 }
 0xe4f   : > { %s2489_s22 = scalar_lea.hbm %s3998_s11, %s2920_s23  ;;  %s3213_s7 = scalar_lea.hbm %s3998_s11, 16 }
 0xe50   : > { %s2493_s2 = sshll.u32 %s2489_s22, 4  ;;  %s2494_s2 = int_to_ptr.hbm [resolvable:$true] %s2493_s2 }
 0xe51   : > { %s3207_s1 = sshra.s32 %s2494_s2, 4  ;;  %s3208_s1 = int_to_ptr.hbm [resolvable:$true] %s3207_s1 }
 0xe52   : > { %s3209_s28 = scalar_lea.hbm %s3208_s1, 8  ;;  %p3214_p13 = scmp.lt.s32.totalorder %s3208_s1, %s3998_s11 }
 0xe53   : > { %p3210_p11 = scmp.ne.s32.totalorder %s3208_s1, %s3209_s28  ;;  %p3215_p0 = scmp.lt.s32.totalorder %s3213_s7, %s3209_s28 }
 0xe55   : > { %p3211_p10 = pnand %p3210_p11, %p3567_p3  ;;  %p3216_p1 = por %p3215_p0, %p3214_p13 }
 0xe57   : > { %p3212_p12 = pneg %p3211_p10 }
 0xe59   : > { %p3217_p2 = pnand %p3216_p1, %p3212_p12 }
 0xe5b   : > { %3220 = shalt.err (!%p3217_p2)
}
 0xe5c   : > { %2961 = dma.vmem_to_hbm [thread:$0]  (%p3567_p3), %s2492_s15, 128, %s2494_s2, %s2465_s0  }
 0xe5d PF: > { %s3999_s9 = sld [smem:[#allocation40_spill]] }
 0xe5e   : > { %s4000_s23 = sld [smem:[#allocation33_spill]] }
 0xe63   : > { %p2977_p4 = scmp.ge.s32.totalorder %s3999_s9, 2 }
 0xe64   : > { %s2505_s29 = sand.u32 1, %s4000_s23  }
 0xe65   : > { %p2969_p5 = pnand %p2977_p4, %p3577_p9  ;;  %s2506_s21 = scalar_lea.sflag [#allocation4], %s2505_s29 }
 0xe67   : > { %p2970_p6 = pneg %p2969_p5 }
 0xe69   : > { %3258 = dma.done.wait (%p2970_p6), %s2506_s21, 128  }
 0xe6a   : > { %3260 = vsyncadd (%p2970_p6), %s2506_s21, 4294967168  ;;  %s2516_s26 = scalar_lea.sflag [#allocation8], %s2505_s29 }
 0xe6b   : > { %3262 = dma.done.wait (%p2970_p6), %s2516_s26, 128  }
 0xe6c   : > { %3264 = vsyncadd (%p2970_p6), %s2516_s26, 4294967168  ;;  %s81_s0 = sadd.s32 1, %s3999_s9   ;;  %s4002_s22 = sld [smem:[#allocation34_spill]] }
 0xe6d   : > { %p78_p7 = scmp.ge.s32.totalorder %s81_s0, 6   ;;  %s4003_s23 = sld [smem:[#allocation35_spill]] }
 0xe6e   : > { %s4004_s26 = sld [smem:[#allocation45_spill]] }
 0xe6f   : > { %s4005_s28 = sld [smem:[#allocation38_spill]]  ;;  %80 = sbr.rel (!%p78_p7) target bundleno = 66 (0x42), region = 272 }
 0xe70   : > { %s4006_s1 = sld [smem:[#allocation39_spill]] }
 0xe71   : > { %s4007_s2 = sld [smem:[#allocation41_spill]] }
 0xe72   : > { %s4008_s7 = sld [smem:[#allocation43_spill]] }
 0xe74   :  { %2522 = vsyncpa [#allocation4], 1 }
 0xe75   :  { %2524 = vsyncpa [#allocation4 + $0x1], 1 }
 0xe76   :  { %2525 = vsyncpa [#allocation8], 1 }
 0xe77   :  { %2527 = vsyncpa [#allocation8 + $0x1], 1 }
 0xe78   :  { %2528 = vsyncpa [#allocation5], 1 }
 0xe79   :  { %2530 = vsyncpa [#allocation5 + $0x1], 1 }

</bundles_post_ra>
